<compile_context>
chip_gen: v5e
topology: v5e:2x2
jax: 0.10.0
libtpu: 0.0.40
codegen_flags: <defaults>
</compile_context>

<pallas_src>
import functools

import jax
import jax.numpy as jnp
from jax import lax
from jax.experimental import pallas as pl
from jax.experimental.pallas import tpu as pltpu


def sent_att_kernel(x_ref, labels_ref,
                    wih_ref, whh_ref, aw_ref, slab_ref,
                    prob_ref, loss_ref,
                    *, seq_len, b_real):
    TB, H = x_ref.shape
    T = seq_len
    B = TB // T                          # padded batch (multiple of 8 sublanes)

    # ---- small-parameter slab (one DMA instead of five), all f32 ----
    b_row = slab_ref[0:1, :4 * H]        # (1, 4H)  LSTM bias (b_ih + b_hh)
    ab    = slab_ref[1:2, :H]            # (1, H)   attn_w bias
    av    = slab_ref[2:3, :H]            # (1, H)   attn_v weight
    fw    = slab_ref[3:4, :H]            # (1, H)   fc weight
    fb    = slab_ref[4:5, 0:1]           # (1, 1)   fc bias

    whh = whh_ref[...]                   # (H, 4H)  bf16 (= W_hh^T)
    aw  = aw_ref[...]                    # (H, H)   bf16 (= attn_w^T)

    # ---- hoisted input projection: ONE bf16 matmul, f32 accumulation ----
    xw = jnp.dot(x_ref[...], wih_ref[...],
                 preferred_element_type=jnp.float32) + b_row          # (T*B, 4H) f32

    # ---- LSTM recurrence, fully unrolled; h kept as SSA values ----
    # TODO(synk): stage whh in the MXU across steps (pltpu.matmul_push_rhs /
    # matmul_acc_lhs / matmul_pop) instead of re-pushing the RHS every jnp.dot.
    c = jnp.zeros((B, H), jnp.float32)
    h_b16 = jnp.zeros((B, H), jnp.bfloat16)
    h_list = []
    s_list = []
    for t in range(T):
        gates = xw[t * B:(t + 1) * B, :]                              # (B, 4H) f32
        if t > 0:
            gates = gates + jnp.dot(h_b16, whh,
                                    preferred_element_type=jnp.float32)
        # two full-width EUP launches instead of four quarter-width ones
        sig = jax.nn.sigmoid(gates)                                   # (B, 4H)
        i_g = sig[:, 0 * H:1 * H]
        f_g = sig[:, 1 * H:2 * H]
        o_g = sig[:, 3 * H:4 * H]
        g_g = jnp.tanh(gates[:, 2 * H:3 * H])
        c = f_g * c + i_g * g_g
        h = o_g * jnp.tanh(c)                                         # (B, H) f32
        h_b16 = h.astype(jnp.bfloat16)

        # attention energy/score for this step (fills recurrence slack)
        e_t = jnp.tanh(jnp.dot(h_b16, aw,
                               preferred_element_type=jnp.float32) + ab)  # (B, H)
        s_t = jnp.sum(e_t * av, axis=-1, keepdims=True)               # (B, 1)
        h_list.append(h)
        s_list.append(s_t)

    # ---- softmax over time (== F.softmax(weight, 0)); batch on sublanes ----
    s = jnp.concatenate(s_list, axis=1)                               # (B, T)
    s = s - jnp.max(s, axis=1, keepdims=True)
    ex = jnp.exp(s)
    w = ex / jnp.sum(ex, axis=1, keepdims=True)                       # (B, T)

    # ---- weighted time-sum -> context ----
    ctx = jnp.zeros((B, H), jnp.float32)
    for t in range(T):
        ctx = ctx + w[:, t:t + 1] * h_list[t]                         # (B, H)

    # ---- fc (out_features=1): VPU multiply + lane reduce, MXU stays free ----
    logits = jnp.sum(ctx * fw, axis=-1, keepdims=True) + fb           # (B, 1)
    prob = jax.nn.sigmoid(logits)
    prob_ref[...] = prob

    # ---- BCE-style loss over the REAL batch only; mask built from iota ----
    labels = labels_ref[...]                                          # (B, 1)
    row_id = lax.broadcasted_iota(jnp.int32, (B, 1), 0)
    mask = (row_id < int(b_real)).astype(jnp.float32)
    ll = (jnp.log(prob + 1e-10) * labels +
          jnp.log(1.0 - prob + 1e-10) * (1.0 - labels)) * mask
    loss = -jnp.sum(ll) * (1.0 / b_real)
    loss_ref[...] = jnp.reshape(loss, (1, 1))


@jax.jit
def sent_att_net(x, labels, params):
    T, B, H = x.shape
    B_pad = max(8, ((B + 7) // 8) * 8)        # pad batch to >= 8 sublanes
    pad_b = B_pad - B

    # bf16 matmul operands (f32 accumulation in-kernel) halve input DMA bytes
    x_p = jnp.pad(x, ((0, 0), (0, pad_b), (0, 0)))
    x2d = x_p.reshape(T * B_pad, H).astype(jnp.bfloat16)
    labels_p = jnp.pad(labels.astype(jnp.float32), ((0, pad_b), (0, 0)))

    # pack tiny params into one lane-dense (8, L) slab -> one DMA instead of five
    L = max(128, ((4 * H + 127) // 128) * 128)
    slab = jnp.zeros((8, L), jnp.float32)
    slab = slab.at[0, :4 * H].set(params["b"][0])
    slab = slab.at[1, :H].set(params["ab"][0])
    slab = slab.at[2, :H].set(params["av"][:, 0])
    slab = slab.at[3, :H].set(params["fw_t"][:, 0])
    slab = slab.at[4, 0].set(params["fb"][0, 0])

    kernel = functools.partial(sent_att_kernel, seq_len=T, b_real=float(B))
    vmem = pl.BlockSpec(memory_space=pltpu.MemorySpace.VMEM)

    prob_p, loss = pl.pallas_call(
        kernel,
        out_shape=(jax.ShapeDtypeStruct((B_pad, 1), jnp.float32),
                   jax.ShapeDtypeStruct((1, 1), jnp.float32)),
        in_specs=[vmem] * 6,
        out_specs=(vmem, vmem),
    )(x2d, labels_p,
      params["wih_t"].astype(jnp.bfloat16),
      params["whh_t"].astype(jnp.bfloat16),
      params["aw_t"].astype(jnp.bfloat16),
      slab)
    # TODO(synk): for production T*B*H, tile T via a grid axis (persistent h/c
    # scratch, "arbitrary" semantics), add a "parallel" batch-block axis so both
    # v7x TensorCores are used, and budget tiles against v7x's 64 MiB VMEM
    # (stream the xw projection per tile instead of materializing (T*B, 4H)).
    return loss[0, 0], prob_p[:B]


def reference(x, labels, params):
    """Pure-JAX f32 reference of the same math (mirrors PyTorch forward)."""
    T, B, H = x.shape
    wih, whh, b = params["wih_t"], params["whh_t"], params["b"]

    def step(carry, x_t):
        h, c = carry
        gates = x_t @ wih + h @ whh + b
        i_g = jax.nn.sigmoid(gates[:, 0 * H:1 * H])
        f_g = jax.nn.sigmoid(gates[:, 1 * H:2 * H])
        g_g = jnp.tanh(gates[:, 2 * H:3 * H])
        o_g = jax.nn.sigmoid(gates[:, 3 * H:4 * H])
        c_new = f_g * c + i_g * g_g
        h_new = o_g * jnp.tanh(c_new)
        return (h_new, c_new), h_new

    h0 = jnp.zeros((B, H), jnp.float32)
    _, hseq = lax.scan(step, (h0, h0), x)                              # (T, B, H)
    e = jnp.tanh(hseq @ params["aw_t"] + params["ab"])
    s = (e @ params["av"])[..., 0]                                     # (T, B)
    w = jax.nn.softmax(s, axis=0)
    ctx = jnp.sum(w[:, :, None] * hseq, axis=0)                        # (B, H)
    prob = jax.nn.sigmoid(ctx @ params["fw_t"] + params["fb"])         # (B, 1)
    lbl = labels[:, 0]
    loss = -(jnp.log(prob[:, 0] + 1e-10) * lbl +
             jnp.log(1.0 - prob[:, 0] + 1e-10) * (1.0 - lbl)).mean()
    return loss, prob


def init_params(key, H):
    """Deterministic init, shapes per nn.LSTM / nn.Linear in SentAttNet."""
    scale = 1.0 / jnp.sqrt(H)
    ks = jax.random.split(key, 8)
    u = lambda k, shape: jax.random.uniform(k, shape, jnp.float32, -scale, scale)
    w_ih = u(ks[0], (4 * H, H))
    w_hh = u(ks[1], (4 * H, H))
    b_ih = u(ks[2], (4 * H,))
    b_hh = u(ks[3], (4 * H,))
    attn_w = u(ks[4], (H, H))
    attn_b = u(ks[5], (H,))
    attn_v = u(ks[6], (1, H))
    fc_w = u(ks[7], (1, H))
    fc_b = jnp.zeros((1,), jnp.float32)
    return {
        "wih_t": w_ih.T,                              # (H, 4H)
        "whh_t": w_hh.T,                              # (H, 4H)
        "b": (b_ih + b_hh).reshape(1, 4 * H),         # (1, 4H)
        "aw_t": attn_w.T,                             # (H, H)
        "ab": attn_b.reshape(1, H),                   # (1, H)
        "av": attn_v.T,                               # (H, 1)
        "fw_t": fc_w.T,                               # (H, 1)
        "fb": fc_b.reshape(1, 1),                     # (1, 1)
    }


if __name__ == "__main__":
    T, B, H = 8, 4, 32   # seq_len, batch, sentence_hidden

    key = jax.random.PRNGKey(0)
    k_x, k_l, k_p = jax.random.split(key, 3)

    x = jax.random.normal(k_x, (T, B, H), jnp.float32)
    labels = jax.random.bernoulli(k_l, 0.5, (B, 1)).astype(jnp.float32)
    params = init_params(k_p, H)

    loss, prob = sent_att_net(x, labels, params)
    loss, prob = jax.block_until_ready((loss, prob))

    loss_ref, prob_ref = reference(x, labels, params)
    # bf16 matmul operands with f32 accumulation: allow a slightly looser
    # tolerance than pure-f32 while still validating the forward pass.
    assert prob.shape == (B, 1), "prob shape mismatch"
    assert jnp.allclose(prob, prob_ref, atol=3e-3, rtol=3e-3), "prob mismatch"
    assert jnp.allclose(loss, loss_ref, atol=3e-3, rtol=3e-3), "loss mismatch"
    assert bool(jnp.isfinite(loss)) and bool(jnp.all(jnp.isfinite(prob)))

    print("KERNEL_OK")
</pallas_src>

<mosaic_0001>
module attributes {stable_mosaic.version = 11 : i64} {
  func.func @sent_att_kernel(%arg0: memref<64x32xbf16, #tpu.memory_space<vmem>>, %arg1: memref<8x1xf32, #tpu.memory_space<vmem>>, %arg2: memref<32x128xbf16, #tpu.memory_space<vmem>>, %arg3: memref<32x128xbf16, #tpu.memory_space<vmem>>, %arg4: memref<32x32xbf16, #tpu.memory_space<vmem>>, %arg5: memref<8x128xf32, #tpu.memory_space<vmem>>, %arg6: memref<8x1xf32, #tpu.memory_space<vmem>>, %arg7: memref<1x1xf32, #tpu.memory_space<vmem>>) attributes {dimension_semantics = [], scalar_prefetch = 0 : i64, scratch_operands = 0 : i64, tpu.core_type = #tpu.core_type<tc>} {
    %c0 = arith.constant 0 : index
    %c0_0 = arith.constant 0 : index
    %0 = vector.load %arg5[%c0, %c0_0] : memref<8x128xf32, #tpu.memory_space<vmem>>, vector<1x128xf32>
    %c1 = arith.constant 1 : index
    %c0_1 = arith.constant 0 : index
    %1 = vector.load %arg5[%c1, %c0_1] : memref<8x128xf32, #tpu.memory_space<vmem>>, vector<1x32xf32>
    %c2 = arith.constant 2 : index
    %c0_2 = arith.constant 0 : index
    %2 = vector.load %arg5[%c2, %c0_2] : memref<8x128xf32, #tpu.memory_space<vmem>>, vector<1x32xf32>
    %c3 = arith.constant 3 : index
    %c0_3 = arith.constant 0 : index
    %3 = vector.load %arg5[%c3, %c0_3] : memref<8x128xf32, #tpu.memory_space<vmem>>, vector<1x32xf32>
    %c4 = arith.constant 4 : index
    %c0_4 = arith.constant 0 : index
    %4 = vector.load %arg5[%c4, %c0_4] : memref<8x128xf32, #tpu.memory_space<vmem>>, vector<1x1xf32>
    %c0_5 = arith.constant 0 : index
    %c0_6 = arith.constant 0 : index
    %5 = vector.load %arg3[%c0_5, %c0_6] : memref<32x128xbf16, #tpu.memory_space<vmem>>, vector<32x128xbf16>
    %c0_7 = arith.constant 0 : index
    %c0_8 = arith.constant 0 : index
    %6 = vector.load %arg4[%c0_7, %c0_8] : memref<32x32xbf16, #tpu.memory_space<vmem>>, vector<32x32xbf16>
    %c0_9 = arith.constant 0 : index
    %c0_10 = arith.constant 0 : index
    %7 = vector.load %arg0[%c0_9, %c0_10] : memref<64x32xbf16, #tpu.memory_space<vmem>>, vector<64x32xbf16>
    %c0_11 = arith.constant 0 : index
    %c0_12 = arith.constant 0 : index
    %8 = vector.load %arg2[%c0_11, %c0_12] : memref<32x128xbf16, #tpu.memory_space<vmem>>, vector<32x128xbf16>
    %cst = arith.constant dense<0.000000e+00> : vector<64x128xf32>
    %9 = tpu.matmul %7, %8, %cst {dimension_numbers = #tpu.dot_dimension_numbers<[1], [0], [0], [1], [0, 0, 1, 1], [], []>} : vector<64x32xbf16>, vector<32x128xbf16>, vector<64x128xf32> -> vector<64x128xf32>
    %10 = vector.broadcast %0 : vector<1x128xf32> to vector<64x128xf32>
    %11 = arith.addf %9, %10 : vector<64x128xf32>
    %cst_13 = arith.constant 0.000000e+00 : f32
    %12 = vector.broadcast %cst_13 : f32 to vector<8x32xf32>
    %13 = vector.extract_strided_slice %11 {offsets = [0, 0], sizes = [8, 128], strides = [1, 1]} : vector<64x128xf32> to vector<8x128xf32>
    %14 = arith.negf %13 : vector<8x128xf32>
    %15 = math.exp %14 : vector<8x128xf32>
    %cst_14 = arith.constant 1.000000e+00 : f32
    %16 = vector.broadcast %cst_14 : f32 to vector<8x128xf32>
    %17 = arith.addf %16, %15 : vector<8x128xf32>
    %18 = arith.divf %16, %17 : vector<8x128xf32>
    %19 = vector.extract_strided_slice %18 {offsets = [0, 0], sizes = [8, 32], strides = [1, 1]} : vector<8x128xf32> to vector<8x32xf32>
    %20 = vector.extract_strided_slice %18 {offsets = [0, 32], sizes = [8, 32], strides = [1, 1]} : vector<8x128xf32> to vector<8x32xf32>
    %21 = vector.extract_strided_slice %18 {offsets = [0, 96], sizes = [8, 32], strides = [1, 1]} : vector<8x128xf32> to vector<8x32xf32>
    %22 = vector.extract_strided_slice %13 {offsets = [0, 64], sizes = [8, 32], strides = [1, 1]} : vector<8x128xf32> to vector<8x32xf32>
    %23 = math.tanh %22 : vector<8x32xf32>
    %24 = arith.mulf %20, %12 : vector<8x32xf32>
    %25 = arith.mulf %19, %23 : vector<8x32xf32>
    %26 = arith.addf %24, %25 : vector<8x32xf32>
    %27 = math.tanh %26 : vector<8x32xf32>
    %28 = arith.mulf %21, %27 : vector<8x32xf32>
    %29 = arith.truncf %28 : vector<8x32xf32> to vector<8x32xbf16>
    %cst_15 = arith.constant dense<0.000000e+00> : vector<8x32xf32>
    %30 = tpu.matmul %29, %6, %cst_15 {dimension_numbers = #tpu.dot_dimension_numbers<[1], [0], [0], [1], [0, 0, 1, 1], [], []>} : vector<8x32xbf16>, vector<32x32xbf16>, vector<8x32xf32> -> vector<8x32xf32>
    %31 = vector.broadcast %1 : vector<1x32xf32> to vector<8x32xf32>
    %32 = arith.addf %30, %31 : vector<8x32xf32>
    %33 = math.tanh %32 : vector<8x32xf32>
    %34 = vector.broadcast %2 : vector<1x32xf32> to vector<8x32xf32>
    %35 = arith.mulf %33, %34 : vector<8x32xf32>
    %cst_16 = arith.constant dense<0.000000e+00> : vector<8xf32>
    %36 = vector.multi_reduction <add>, %35, %cst_16 [1] : vector<8x32xf32> to vector<8xf32>
    %37 = vector.shape_cast %36 : vector<8xf32> to vector<8x1xf32>
    %38 = vector.extract_strided_slice %11 {offsets = [8, 0], sizes = [8, 128], strides = [1, 1]} : vector<64x128xf32> to vector<8x128xf32>
    %cst_17 = arith.constant dense<0.000000e+00> : vector<8x128xf32>
    %39 = tpu.matmul %29, %5, %cst_17 {dimension_numbers = #tpu.dot_dimension_numbers<[1], [0], [0], [1], [0, 0, 1, 1], [], []>} : vector<8x32xbf16>, vector<32x128xbf16>, vector<8x128xf32> -> vector<8x128xf32>
    %40 = arith.addf %38, %39 : vector<8x128xf32>
    %41 = arith.negf %40 : vector<8x128xf32>
    %42 = math.exp %41 : vector<8x128xf32>
    %cst_18 = arith.constant 1.000000e+00 : f32
    %43 = vector.broadcast %cst_18 : f32 to vector<8x128xf32>
    %44 = arith.addf %43, %42 : vector<8x128xf32>
    %45 = arith.divf %43, %44 : vector<8x128xf32>
    %46 = vector.extract_strided_slice %45 {offsets = [0, 0], sizes = [8, 32], strides = [1, 1]} : vector<8x128xf32> to vector<8x32xf32>
    %47 = vector.extract_strided_slice %45 {offsets = [0, 32], sizes = [8, 32], strides = [1, 1]} : vector<8x128xf32> to vector<8x32xf32>
    %48 = vector.extract_strided_slice %45 {offsets = [0, 96], sizes = [8, 32], strides = [1, 1]} : vector<8x128xf32> to vector<8x32xf32>
    %49 = vector.extract_strided_slice %40 {offsets = [0, 64], sizes = [8, 32], strides = [1, 1]} : vector<8x128xf32> to vector<8x32xf32>
    %50 = math.tanh %49 : vector<8x32xf32>
    %51 = arith.mulf %47, %26 : vector<8x32xf32>
    %52 = arith.mulf %46, %50 : vector<8x32xf32>
    %53 = arith.addf %51, %52 : vector<8x32xf32>
    %54 = math.tanh %53 : vector<8x32xf32>
    %55 = arith.mulf %48, %54 : vector<8x32xf32>
    %56 = arith.truncf %55 : vector<8x32xf32> to vector<8x32xbf16>
    %cst_19 = arith.constant dense<0.000000e+00> : vector<8x32xf32>
    %57 = tpu.matmul %56, %6, %cst_19 {dimension_numbers = #tpu.dot_dimension_numbers<[1], [0], [0], [1], [0, 0, 1, 1], [], []>} : vector<8x32xbf16>, vector<32x32xbf16>, vector<8x32xf32> -> vector<8x32xf32>
    %58 = vector.broadcast %1 : vector<1x32xf32> to vector<8x32xf32>
    %59 = arith.addf %57, %58 : vector<8x32xf32>
    %60 = math.tanh %59 : vector<8x32xf32>
    %61 = vector.broadcast %2 : vector<1x32xf32> to vector<8x32xf32>
    %62 = arith.mulf %60, %61 : vector<8x32xf32>
    %cst_20 = arith.constant dense<0.000000e+00> : vector<8xf32>
    %63 = vector.multi_reduction <add>, %62, %cst_20 [1] : vector<8x32xf32> to vector<8xf32>
    %64 = vector.shape_cast %63 : vector<8xf32> to vector<8x1xf32>
    %65 = vector.extract_strided_slice %11 {offsets = [16, 0], sizes = [8, 128], strides = [1, 1]} : vector<64x128xf32> to vector<8x128xf32>
    %cst_21 = arith.constant dense<0.000000e+00> : vector<8x128xf32>
    %66 = tpu.matmul %56, %5, %cst_21 {dimension_numbers = #tpu.dot_dimension_numbers<[1], [0], [0], [1], [0, 0, 1, 1], [], []>} : vector<8x32xbf16>, vector<32x128xbf16>, vector<8x128xf32> -> vector<8x128xf32>
    %67 = arith.addf %65, %66 : vector<8x128xf32>
    %68 = arith.negf %67 : vector<8x128xf32>
    %69 = math.exp %68 : vector<8x128xf32>
    %cst_22 = arith.constant 1.000000e+00 : f32
    %70 = vector.broadcast %cst_22 : f32 to vector<8x128xf32>
    %71 = arith.addf %70, %69 : vector<8x128xf32>
    %72 = arith.divf %70, %71 : vector<8x128xf32>
    %73 = vector.extract_strided_slice %72 {offsets = [0, 0], sizes = [8, 32], strides = [1, 1]} : vector<8x128xf32> to vector<8x32xf32>
    %74 = vector.extract_strided_slice %72 {offsets = [0, 32], sizes = [8, 32], strides = [1, 1]} : vector<8x128xf32> to vector<8x32xf32>
    %75 = vector.extract_strided_slice %72 {offsets = [0, 96], sizes = [8, 32], strides = [1, 1]} : vector<8x128xf32> to vector<8x32xf32>
    %76 = vector.extract_strided_slice %67 {offsets = [0, 64], sizes = [8, 32], strides = [1, 1]} : vector<8x128xf32> to vector<8x32xf32>
    %77 = math.tanh %76 : vector<8x32xf32>
    %78 = arith.mulf %74, %53 : vector<8x32xf32>
    %79 = arith.mulf %73, %77 : vector<8x32xf32>
    %80 = arith.addf %78, %79 : vector<8x32xf32>
    %81 = math.tanh %80 : vector<8x32xf32>
    %82 = arith.mulf %75, %81 : vector<8x32xf32>
    %83 = arith.truncf %82 : vector<8x32xf32> to vector<8x32xbf16>
    %cst_23 = arith.constant dense<0.000000e+00> : vector<8x32xf32>
    %84 = tpu.matmul %83, %6, %cst_23 {dimension_numbers = #tpu.dot_dimension_numbers<[1], [0], [0], [1], [0, 0, 1, 1], [], []>} : vector<8x32xbf16>, vector<32x32xbf16>, vector<8x32xf32> -> vector<8x32xf32>
    %85 = vector.broadcast %1 : vector<1x32xf32> to vector<8x32xf32>
    %86 = arith.addf %84, %85 : vector<8x32xf32>
    %87 = math.tanh %86 : vector<8x32xf32>
    %88 = vector.broadcast %2 : vector<1x32xf32> to vector<8x32xf32>
    %89 = arith.mulf %87, %88 : vector<8x32xf32>
    %cst_24 = arith.constant dense<0.000000e+00> : vector<8xf32>
    %90 = vector.multi_reduction <add>, %89, %cst_24 [1] : vector<8x32xf32> to vector<8xf32>
    %91 = vector.shape_cast %90 : vector<8xf32> to vector<8x1xf32>
    %92 = vector.extract_strided_slice %11 {offsets = [24, 0], sizes = [8, 128], strides = [1, 1]} : vector<64x128xf32> to vector<8x128xf32>
    %cst_25 = arith.constant dense<0.000000e+00> : vector<8x128xf32>
    %93 = tpu.matmul %83, %5, %cst_25 {dimension_numbers = #tpu.dot_dimension_numbers<[1], [0], [0], [1], [0, 0, 1, 1], [], []>} : vector<8x32xbf16>, vector<32x128xbf16>, vector<8x128xf32> -> vector<8x128xf32>
    %94 = arith.addf %92, %93 : vector<8x128xf32>
    %95 = arith.negf %94 : vector<8x128xf32>
    %96 = math.exp %95 : vector<8x128xf32>
    %cst_26 = arith.constant 1.000000e+00 : f32
    %97 = vector.broadcast %cst_26 : f32 to vector<8x128xf32>
    %98 = arith.addf %97, %96 : vector<8x128xf32>
    %99 = arith.divf %97, %98 : vector<8x128xf32>
    %100 = vector.extract_strided_slice %99 {offsets = [0, 0], sizes = [8, 32], strides = [1, 1]} : vector<8x128xf32> to vector<8x32xf32>
    %101 = vector.extract_strided_slice %99 {offsets = [0, 32], sizes = [8, 32], strides = [1, 1]} : vector<8x128xf32> to vector<8x32xf32>
    %102 = vector.extract_strided_slice %99 {offsets = [0, 96], sizes = [8, 32], strides = [1, 1]} : vector<8x128xf32> to vector<8x32xf32>
    %103 = vector.extract_strided_slice %94 {offsets = [0, 64], sizes = [8, 32], strides = [1, 1]} : vector<8x128xf32> to vector<8x32xf32>
    %104 = math.tanh %103 : vector<8x32xf32>
    %105 = arith.mulf %101, %80 : vector<8x32xf32>
    %106 = arith.mulf %100, %104 : vector<8x32xf32>
    %107 = arith.addf %105, %106 : vector<8x32xf32>
    %108 = math.tanh %107 : vector<8x32xf32>
    %109 = arith.mulf %102, %108 : vector<8x32xf32>
    %110 = arith.truncf %109 : vector<8x32xf32> to vector<8x32xbf16>
    %cst_27 = arith.constant dense<0.000000e+00> : vector<8x32xf32>
    %111 = tpu.matmul %110, %6, %cst_27 {dimension_numbers = #tpu.dot_dimension_numbers<[1], [0], [0], [1], [0, 0, 1, 1], [], []>} : vector<8x32xbf16>, vector<32x32xbf16>, vector<8x32xf32> -> vector<8x32xf32>
    %112 = vector.broadcast %1 : vector<1x32xf32> to vector<8x32xf32>
    %113 = arith.addf %111, %112 : vector<8x32xf32>
    %114 = math.tanh %113 : vector<8x32xf32>
    %115 = vector.broadcast %2 : vector<1x32xf32> to vector<8x32xf32>
    %116 = arith.mulf %114, %115 : vector<8x32xf32>
    %cst_28 = arith.constant dense<0.000000e+00> : vector<8xf32>
    %117 = vector.multi_reduction <add>, %116, %cst_28 [1] : vector<8x32xf32> to vector<8xf32>
    %118 = vector.shape_cast %117 : vector<8xf32> to vector<8x1xf32>
    %119 = vector.extract_strided_slice %11 {offsets = [32, 0], sizes = [8, 128], strides = [1, 1]} : vector<64x128xf32> to vector<8x128xf32>
    %cst_29 = arith.constant dense<0.000000e+00> : vector<8x128xf32>
    %120 = tpu.matmul %110, %5, %cst_29 {dimension_numbers = #tpu.dot_dimension_numbers<[1], [0], [0], [1], [0, 0, 1, 1], [], []>} : vector<8x32xbf16>, vector<32x128xbf16>, vector<8x128xf32> -> vector<8x128xf32>
    %121 = arith.addf %119, %120 : vector<8x128xf32>
    %122 = arith.negf %121 : vector<8x128xf32>
    %123 = math.exp %122 : vector<8x128xf32>
    %cst_30 = arith.constant 1.000000e+00 : f32
    %124 = vector.broadcast %cst_30 : f32 to vector<8x128xf32>
    %125 = arith.addf %124, %123 : vector<8x128xf32>
    %126 = arith.divf %124, %125 : vector<8x128xf32>
    %127 = vector.extract_strided_slice %126 {offsets = [0, 0], sizes = [8, 32], strides = [1, 1]} : vector<8x128xf32> to vector<8x32xf32>
    %128 = vector.extract_strided_slice %126 {offsets = [0, 32], sizes = [8, 32], strides = [1, 1]} : vector<8x128xf32> to vector<8x32xf32>
    %129 = vector.extract_strided_slice %126 {offsets = [0, 96], sizes = [8, 32], strides = [1, 1]} : vector<8x128xf32> to vector<8x32xf32>
    %130 = vector.extract_strided_slice %121 {offsets = [0, 64], sizes = [8, 32], strides = [1, 1]} : vector<8x128xf32> to vector<8x32xf32>
    %131 = math.tanh %130 : vector<8x32xf32>
    %132 = arith.mulf %128, %107 : vector<8x32xf32>
    %133 = arith.mulf %127, %131 : vector<8x32xf32>
    %134 = arith.addf %132, %133 : vector<8x32xf32>
    %135 = math.tanh %134 : vector<8x32xf32>
    %136 = arith.mulf %129, %135 : vector<8x32xf32>
    %137 = arith.truncf %136 : vector<8x32xf32> to vector<8x32xbf16>
    %cst_31 = arith.constant dense<0.000000e+00> : vector<8x32xf32>
    %138 = tpu.matmul %137, %6, %cst_31 {dimension_numbers = #tpu.dot_dimension_numbers<[1], [0], [0], [1], [0, 0, 1, 1], [], []>} : vector<8x32xbf16>, vector<32x32xbf16>, vector<8x32xf32> -> vector<8x32xf32>
    %139 = vector.broadcast %1 : vector<1x32xf32> to vector<8x32xf32>
    %140 = arith.addf %138, %139 : vector<8x32xf32>
    %141 = math.tanh %140 : vector<8x32xf32>
    %142 = vector.broadcast %2 : vector<1x32xf32> to vector<8x32xf32>
    %143 = arith.mulf %141, %142 : vector<8x32xf32>
    %cst_32 = arith.constant dense<0.000000e+00> : vector<8xf32>
    %144 = vector.multi_reduction <add>, %143, %cst_32 [1] : vector<8x32xf32> to vector<8xf32>
    %145 = vector.shape_cast %144 : vector<8xf32> to vector<8x1xf32>
    %146 = vector.extract_strided_slice %11 {offsets = [40, 0], sizes = [8, 128], strides = [1, 1]} : vector<64x128xf32> to vector<8x128xf32>
    %cst_33 = arith.constant dense<0.000000e+00> : vector<8x128xf32>
    %147 = tpu.matmul %137, %5, %cst_33 {dimension_numbers = #tpu.dot_dimension_numbers<[1], [0], [0], [1], [0, 0, 1, 1], [], []>} : vector<8x32xbf16>, vector<32x128xbf16>, vector<8x128xf32> -> vector<8x128xf32>
    %148 = arith.addf %146, %147 : vector<8x128xf32>
    %149 = arith.negf %148 : vector<8x128xf32>
    %150 = math.exp %149 : vector<8x128xf32>
    %cst_34 = arith.constant 1.000000e+00 : f32
    %151 = vector.broadcast %cst_34 : f32 to vector<8x128xf32>
    %152 = arith.addf %151, %150 : vector<8x128xf32>
    %153 = arith.divf %151, %152 : vector<8x128xf32>
    %154 = vector.extract_strided_slice %153 {offsets = [0, 0], sizes = [8, 32], strides = [1, 1]} : vector<8x128xf32> to vector<8x32xf32>
    %155 = vector.extract_strided_slice %153 {offsets = [0, 32], sizes = [8, 32], strides = [1, 1]} : vector<8x128xf32> to vector<8x32xf32>
    %156 = vector.extract_strided_slice %153 {offsets = [0, 96], sizes = [8, 32], strides = [1, 1]} : vector<8x128xf32> to vector<8x32xf32>
    %157 = vector.extract_strided_slice %148 {offsets = [0, 64], sizes = [8, 32], strides = [1, 1]} : vector<8x128xf32> to vector<8x32xf32>
    %158 = math.tanh %157 : vector<8x32xf32>
    %159 = arith.mulf %155, %134 : vector<8x32xf32>
    %160 = arith.mulf %154, %158 : vector<8x32xf32>
    %161 = arith.addf %159, %160 : vector<8x32xf32>
    %162 = math.tanh %161 : vector<8x32xf32>
    %163 = arith.mulf %156, %162 : vector<8x32xf32>
    %164 = arith.truncf %163 : vector<8x32xf32> to vector<8x32xbf16>
    %cst_35 = arith.constant dense<0.000000e+00> : vector<8x32xf32>
    %165 = tpu.matmul %164, %6, %cst_35 {dimension_numbers = #tpu.dot_dimension_numbers<[1], [0], [0], [1], [0, 0, 1, 1], [], []>} : vector<8x32xbf16>, vector<32x32xbf16>, vector<8x32xf32> -> vector<8x32xf32>
    %166 = vector.broadcast %1 : vector<1x32xf32> to vector<8x32xf32>
    %167 = arith.addf %165, %166 : vector<8x32xf32>
    %168 = math.tanh %167 : vector<8x32xf32>
    %169 = vector.broadcast %2 : vector<1x32xf32> to vector<8x32xf32>
    %170 = arith.mulf %168, %169 : vector<8x32xf32>
    %cst_36 = arith.constant dense<0.000000e+00> : vector<8xf32>
    %171 = vector.multi_reduction <add>, %170, %cst_36 [1] : vector<8x32xf32> to vector<8xf32>
    %172 = vector.shape_cast %171 : vector<8xf32> to vector<8x1xf32>
    %173 = vector.extract_strided_slice %11 {offsets = [48, 0], sizes = [8, 128], strides = [1, 1]} : vector<64x128xf32> to vector<8x128xf32>
    %cst_37 = arith.constant dense<0.000000e+00> : vector<8x128xf32>
    %174 = tpu.matmul %164, %5, %cst_37 {dimension_numbers = #tpu.dot_dimension_numbers<[1], [0], [0], [1], [0, 0, 1, 1], [], []>} : vector<8x32xbf16>, vector<32x128xbf16>, vector<8x128xf32> -> vector<8x128xf32>
    %175 = arith.addf %173, %174 : vector<8x128xf32>
    %176 = arith.negf %175 : vector<8x128xf32>
    %177 = math.exp %176 : vector<8x128xf32>
    %cst_38 = arith.constant 1.000000e+00 : f32
    %178 = vector.broadcast %cst_38 : f32 to vector<8x128xf32>
    %179 = arith.addf %178, %177 : vector<8x128xf32>
    %180 = arith.divf %178, %179 : vector<8x128xf32>
    %181 = vector.extract_strided_slice %180 {offsets = [0, 0], sizes = [8, 32], strides = [1, 1]} : vector<8x128xf32> to vector<8x32xf32>
    %182 = vector.extract_strided_slice %180 {offsets = [0, 32], sizes = [8, 32], strides = [1, 1]} : vector<8x128xf32> to vector<8x32xf32>
    %183 = vector.extract_strided_slice %180 {offsets = [0, 96], sizes = [8, 32], strides = [1, 1]} : vector<8x128xf32> to vector<8x32xf32>
    %184 = vector.extract_strided_slice %175 {offsets = [0, 64], sizes = [8, 32], strides = [1, 1]} : vector<8x128xf32> to vector<8x32xf32>
    %185 = math.tanh %184 : vector<8x32xf32>
    %186 = arith.mulf %182, %161 : vector<8x32xf32>
    %187 = arith.mulf %181, %185 : vector<8x32xf32>
    %188 = arith.addf %186, %187 : vector<8x32xf32>
    %189 = math.tanh %188 : vector<8x32xf32>
    %190 = arith.mulf %183, %189 : vector<8x32xf32>
    %191 = arith.truncf %190 : vector<8x32xf32> to vector<8x32xbf16>
    %cst_39 = arith.constant dense<0.000000e+00> : vector<8x32xf32>
    %192 = tpu.matmul %191, %6, %cst_39 {dimension_numbers = #tpu.dot_dimension_numbers<[1], [0], [0], [1], [0, 0, 1, 1], [], []>} : vector<8x32xbf16>, vector<32x32xbf16>, vector<8x32xf32> -> vector<8x32xf32>
    %193 = vector.broadcast %1 : vector<1x32xf32> to vector<8x32xf32>
    %194 = arith.addf %192, %193 : vector<8x32xf32>
    %195 = math.tanh %194 : vector<8x32xf32>
    %196 = vector.broadcast %2 : vector<1x32xf32> to vector<8x32xf32>
    %197 = arith.mulf %195, %196 : vector<8x32xf32>
    %cst_40 = arith.constant dense<0.000000e+00> : vector<8xf32>
    %198 = vector.multi_reduction <add>, %197, %cst_40 [1] : vector<8x32xf32> to vector<8xf32>
    %199 = vector.shape_cast %198 : vector<8xf32> to vector<8x1xf32>
    %200 = vector.extract_strided_slice %11 {offsets = [56, 0], sizes = [8, 128], strides = [1, 1]} : vector<64x128xf32> to vector<8x128xf32>
    %cst_41 = arith.constant dense<0.000000e+00> : vector<8x128xf32>
    %201 = tpu.matmul %191, %5, %cst_41 {dimension_numbers = #tpu.dot_dimension_numbers<[1], [0], [0], [1], [0, 0, 1, 1], [], []>} : vector<8x32xbf16>, vector<32x128xbf16>, vector<8x128xf32> -> vector<8x128xf32>
    %202 = arith.addf %200, %201 : vector<8x128xf32>
    %203 = arith.negf %202 : vector<8x128xf32>
    %204 = math.exp %203 : vector<8x128xf32>
    %cst_42 = arith.constant 1.000000e+00 : f32
    %205 = vector.broadcast %cst_42 : f32 to vector<8x128xf32>
    %206 = arith.addf %205, %204 : vector<8x128xf32>
    %207 = arith.divf %205, %206 : vector<8x128xf32>
    %208 = vector.extract_strided_slice %207 {offsets = [0, 0], sizes = [8, 32], strides = [1, 1]} : vector<8x128xf32> to vector<8x32xf32>
    %209 = vector.extract_strided_slice %207 {offsets = [0, 32], sizes = [8, 32], strides = [1, 1]} : vector<8x128xf32> to vector<8x32xf32>
    %210 = vector.extract_strided_slice %207 {offsets = [0, 96], sizes = [8, 32], strides = [1, 1]} : vector<8x128xf32> to vector<8x32xf32>
    %211 = vector.extract_strided_slice %202 {offsets = [0, 64], sizes = [8, 32], strides = [1, 1]} : vector<8x128xf32> to vector<8x32xf32>
    %212 = math.tanh %211 : vector<8x32xf32>
    %213 = arith.mulf %209, %188 : vector<8x32xf32>
    %214 = arith.mulf %208, %212 : vector<8x32xf32>
    %215 = arith.addf %213, %214 : vector<8x32xf32>
    %216 = math.tanh %215 : vector<8x32xf32>
    %217 = arith.mulf %210, %216 : vector<8x32xf32>
    %218 = arith.truncf %217 : vector<8x32xf32> to vector<8x32xbf16>
    %cst_43 = arith.constant dense<0.000000e+00> : vector<8x32xf32>
    %219 = tpu.matmul %218, %6, %cst_43 {dimension_numbers = #tpu.dot_dimension_numbers<[1], [0], [0], [1], [0, 0, 1, 1], [], []>} : vector<8x32xbf16>, vector<32x32xbf16>, vector<8x32xf32> -> vector<8x32xf32>
    %220 = vector.broadcast %1 : vector<1x32xf32> to vector<8x32xf32>
    %221 = arith.addf %219, %220 : vector<8x32xf32>
    %222 = math.tanh %221 : vector<8x32xf32>
    %223 = vector.broadcast %2 : vector<1x32xf32> to vector<8x32xf32>
    %224 = arith.mulf %222, %223 : vector<8x32xf32>
    %cst_44 = arith.constant dense<0.000000e+00> : vector<8xf32>
    %225 = vector.multi_reduction <add>, %224, %cst_44 [1] : vector<8x32xf32> to vector<8xf32>
    %226 = vector.shape_cast %225 : vector<8xf32> to vector<8x1xf32>
    %227 = tpu.concatenate %37, %64, %91, %118, %145, %172, %199, %226 in 1 : vector<8x1xf32>, vector<8x1xf32>, vector<8x1xf32>, vector<8x1xf32>, vector<8x1xf32>, vector<8x1xf32>, vector<8x1xf32>, vector<8x1xf32> -> vector<8x8xf32>
    %cst_45 = arith.constant dense<0xFF800000> : vector<8xf32>
    %228 = vector.multi_reduction <maximumf>, %227, %cst_45 [1] : vector<8x8xf32> to vector<8xf32>
    %229 = vector.shape_cast %228 : vector<8xf32> to vector<8x1xf32>
    %230 = vector.broadcast %229 : vector<8x1xf32> to vector<8x8xf32>
    %231 = arith.subf %227, %230 : vector<8x8xf32>
    %232 = math.exp %231 : vector<8x8xf32>
    %cst_46 = arith.constant dense<0.000000e+00> : vector<8xf32>
    %233 = vector.multi_reduction <add>, %232, %cst_46 [1] : vector<8x8xf32> to vector<8xf32>
    %234 = vector.shape_cast %233 : vector<8xf32> to vector<8x1xf32>
    %235 = vector.broadcast %234 : vector<8x1xf32> to vector<8x8xf32>
    %236 = arith.divf %232, %235 : vector<8x8xf32>
    %cst_47 = arith.constant 0.000000e+00 : f32
    %237 = vector.broadcast %cst_47 : f32 to vector<8x32xf32>
    %238 = vector.extract_strided_slice %236 {offsets = [0, 0], sizes = [8, 1], strides = [1, 1]} : vector<8x8xf32> to vector<8x1xf32>
    %239 = vector.broadcast %238 : vector<8x1xf32> to vector<8x32xf32>
    %240 = arith.mulf %239, %28 : vector<8x32xf32>
    %241 = arith.addf %237, %240 : vector<8x32xf32>
    %242 = vector.extract_strided_slice %236 {offsets = [0, 1], sizes = [8, 1], strides = [1, 1]} : vector<8x8xf32> to vector<8x1xf32>
    %243 = vector.broadcast %242 : vector<8x1xf32> to vector<8x32xf32>
    %244 = arith.mulf %243, %55 : vector<8x32xf32>
    %245 = arith.addf %241, %244 : vector<8x32xf32>
    %246 = vector.extract_strided_slice %236 {offsets = [0, 2], sizes = [8, 1], strides = [1, 1]} : vector<8x8xf32> to vector<8x1xf32>
    %247 = vector.broadcast %246 : vector<8x1xf32> to vector<8x32xf32>
    %248 = arith.mulf %247, %82 : vector<8x32xf32>
    %249 = arith.addf %245, %248 : vector<8x32xf32>
    %250 = vector.extract_strided_slice %236 {offsets = [0, 3], sizes = [8, 1], strides = [1, 1]} : vector<8x8xf32> to vector<8x1xf32>
    %251 = vector.broadcast %250 : vector<8x1xf32> to vector<8x32xf32>
    %252 = arith.mulf %251, %109 : vector<8x32xf32>
    %253 = arith.addf %249, %252 : vector<8x32xf32>
    %254 = vector.extract_strided_slice %236 {offsets = [0, 4], sizes = [8, 1], strides = [1, 1]} : vector<8x8xf32> to vector<8x1xf32>
    %255 = vector.broadcast %254 : vector<8x1xf32> to vector<8x32xf32>
    %256 = arith.mulf %255, %136 : vector<8x32xf32>
    %257 = arith.addf %253, %256 : vector<8x32xf32>
    %258 = vector.extract_strided_slice %236 {offsets = [0, 5], sizes = [8, 1], strides = [1, 1]} : vector<8x8xf32> to vector<8x1xf32>
    %259 = vector.broadcast %258 : vector<8x1xf32> to vector<8x32xf32>
    %260 = arith.mulf %259, %163 : vector<8x32xf32>
    %261 = arith.addf %257, %260 : vector<8x32xf32>
    %262 = vector.extract_strided_slice %236 {offsets = [0, 6], sizes = [8, 1], strides = [1, 1]} : vector<8x8xf32> to vector<8x1xf32>
    %263 = vector.broadcast %262 : vector<8x1xf32> to vector<8x32xf32>
    %264 = arith.mulf %263, %190 : vector<8x32xf32>
    %265 = arith.addf %261, %264 : vector<8x32xf32>
    %266 = vector.extract_strided_slice %236 {offsets = [0, 7], sizes = [8, 1], strides = [1, 1]} : vector<8x8xf32> to vector<8x1xf32>
    %267 = vector.broadcast %266 : vector<8x1xf32> to vector<8x32xf32>
    %268 = arith.mulf %267, %217 : vector<8x32xf32>
    %269 = arith.addf %265, %268 : vector<8x32xf32>
    %270 = vector.broadcast %3 : vector<1x32xf32> to vector<8x32xf32>
    %271 = arith.mulf %269, %270 : vector<8x32xf32>
    %cst_48 = arith.constant dense<0.000000e+00> : vector<8xf32>
    %272 = vector.multi_reduction <add>, %271, %cst_48 [1] : vector<8x32xf32> to vector<8xf32>
    %273 = vector.shape_cast %272 : vector<8xf32> to vector<8x1xf32>
    %274 = vector.broadcast %4 : vector<1x1xf32> to vector<8x1xf32>
    %275 = arith.addf %273, %274 : vector<8x1xf32>
    %276 = arith.negf %275 : vector<8x1xf32>
    %277 = math.exp %276 : vector<8x1xf32>
    %cst_49 = arith.constant 1.000000e+00 : f32
    %278 = vector.broadcast %cst_49 : f32 to vector<8x1xf32>
    %279 = arith.addf %278, %277 : vector<8x1xf32>
    %280 = arith.divf %278, %279 : vector<8x1xf32>
    %c0_50 = arith.constant 0 : index
    %c0_51 = arith.constant 0 : index
    %281 = vector.load %arg6[%c0_50, %c0_51] : memref<8x1xf32, #tpu.memory_space<vmem>>, vector<8x1xf32>
    tpu.vector_store %arg6[%c0_50, %c0_51], %280 {strides = array<i32>} : memref<8x1xf32, #tpu.memory_space<vmem>>, vector<8x1xf32>,
    %c0_52 = arith.constant 0 : index
    %c0_53 = arith.constant 0 : index
    %282 = vector.load %arg1[%c0_52, %c0_53] : memref<8x1xf32, #tpu.memory_space<vmem>>, vector<8x1xf32>
    %283 = tpu.iota {dimensions = array<i32: 0>} : vector<8x1xi32>
    %c4_i32 = arith.constant 4 : i32
    %284 = vector.broadcast %c4_i32 : i32 to vector<8x1xi32>
    %285 = arith.cmpi slt, %283, %284 : vector<8x1xi32>
    %286 = arith.extui %285 : vector<8x1xi1> to vector<8x1xi32>
    %287 = arith.sitofp %286 : vector<8x1xi32> to vector<8x1xf32>
    %cst_54 = arith.constant 1.000000e-10 : f32
    %288 = vector.broadcast %cst_54 : f32 to vector<8x1xf32>
    %289 = arith.addf %280, %288 : vector<8x1xf32>
    %290 = math.log %289 : vector<8x1xf32>
    %291 = arith.mulf %290, %282 : vector<8x1xf32>
    %cst_55 = arith.constant 1.000000e+00 : f32
    %292 = vector.broadcast %cst_55 : f32 to vector<8x1xf32>
    %293 = arith.subf %292, %280 : vector<8x1xf32>
    %cst_56 = arith.constant 1.000000e-10 : f32
    %294 = vector.broadcast %cst_56 : f32 to vector<8x1xf32>
    %295 = arith.addf %293, %294 : vector<8x1xf32>
    %296 = math.log %295 : vector<8x1xf32>
    %cst_57 = arith.constant 1.000000e+00 : f32
    %297 = vector.broadcast %cst_57 : f32 to vector<8x1xf32>
    %298 = arith.subf %297, %282 : vector<8x1xf32>
    %299 = arith.mulf %296, %298 : vector<8x1xf32>
    %300 = arith.addf %291, %299 : vector<8x1xf32>
    %301 = arith.mulf %300, %287 : vector<8x1xf32>
    %302 = vector.shape_cast %301 : vector<8x1xf32> to vector<1x8x1xf32>
    %cst_58 = arith.constant dense<0.000000e+00> : vector<1xf32>
    %303 = vector.multi_reduction <add>, %302, %cst_58 [1, 2] : vector<1x8x1xf32> to vector<1xf32>
    %304 = vector.shape_cast %303 : vector<1xf32> to vector<1x1x1xf32>
    %305 = vector.extract %304[0, 0, 0] : f32 from vector<1x1x1xf32>
    %cst_59 = arith.constant 0.000000e+00 : f32
    %306 = arith.subf %cst_59, %305 : f32
    %cst_60 = arith.constant 2.500000e-01 : f32
    %307 = arith.mulf %306, %cst_60 : f32
    %308 = vector.broadcast %307 : f32 to vector<1x1xf32>
    %c0_61 = arith.constant 0 : index
    %c0_62 = arith.constant 0 : index
    %309 = vector.load %arg7[%c0_61, %c0_62] : memref<1x1xf32, #tpu.memory_space<vmem>>, vector<1x1xf32>
    tpu.vector_store %arg7[%c0_61, %c0_62], %308 {strides = array<i32>} : memref<1x1xf32, #tpu.memory_space<vmem>>, vector<1x1xf32>,
    return
  }
}

</mosaic_0001>

<bundles_post_ra>
// kernel: sent_att_net.1
= control target key start
LH: loop header
LB: loop body
LE: loop exit
PB: predicated region body
PF: predicated region fallthrough
CT: control target
= control target key end

     0   :  { %s1437_s0 = inlined_call_operand.vmem [shape: bf16[64,32], index: 0, kind: input, shape index: {}]   ;;  %s1438_s1 = inlined_call_operand.vmem [shape: f32[8,1], index: 1, kind: input, shape index: {}]   ;;  %s1439_s2 = inlined_call_operand.vmem [shape: bf16[32,128], index: 2, kind: input, shape index: {}]   ;;  %s1440_s3 = inlined_call_operand.vmem [shape: bf16[32,128], index: 3, kind: input, shape index: {}]   ;;  %s1441_s4 = inlined_call_operand.vmem [shape: bf16[32,32], index: 4, kind: input, shape index: {}]   ;;  %s1442_s5 = inlined_call_operand.vmem [shape: f32[8,128], index: 5, kind: input, shape index: {}]   ;;  %s1443_s6 = inlined_call_operand.vmem [shape: f32[8,1], index: 6, kind: output, shape index: {0}]   ;;  %s1444_s7 = inlined_call_operand.hbm [shape: f32[1,1], index: 7, kind: output, shape index: {1}]  }
   0x1   :  { %v1001_v0 = vld [vmem:[%s1439_s2 + $0x8] sm:$0xff]  ;;  %v1000_v1 = vld [vmem:[%s1439_s2] sm:$0xff] }
   0x2   :  { %104 = vmatpush.bf16.msra.mxu0 %v1001_v0 }
   0x3   :  { %13 = vsyncpa [#allocation3], 0  ;;  %v996_v2 = vld [vmem:[%s1437_s0] sm:$0xff]  ;;  %vm85_vm0 = vcmask 261120   ;;  %s1149_s2 = smov 64   ;;  %s1150_s9 = smov 32  }
   0x4   :  { %v1215_v3 = vld [vmem:[%s1442_s5] ss:$0 sm:$0xff]  ;;  %v1227_v26 = vld [vmem:[%s1441_s4 + $0x8] sm:$0xff]  ;;  %s1155_s27 = smov 96   ;;  %s912_s13 = sshll.u32 %s1444_s7, 4  ;;  %s913_s13 = int_to_ptr.hbm [resolvable:$true] %s912_s13 }
   0x5   :  { %v1232_v27 = vld [vmem:[%s1440_s3 + $0x8] sm:$0xff]  ;;  %190 = vmatpush.bf16.msra.mxu1 %v1227_v26  ;;  %v1239_v28 = vld [vmem:[%s1441_s4] sm:$0xff]  ;;  %279 = vmatpush.bf16.msra.mxu3 %v1227_v26 }
   0x6   :  { %105 = vmatpush.bf16.msra.mxu0 %v1000_v1  ;;  %221 = vmatpush.bf16.msra.mxu2 %v1232_v27  ;;  %v1244_v29 = vld [vmem:[%s1440_s3] sm:$0xff]  ;;  %v997_v61 = vld [vmem:[%s1437_s0 + $0x8] sm:$0xff] }
   0x9   :  { %947 = vmatmul.msk.bf16.vlgmr.msra.gmra.mxu0 %vm85_vm0, %v996_v2  ;;  %191 = vmatpush.bf16.msra.mxu1 %v1239_v28 }
   0xa   :  { %659 = vmatpush.bf16.msrb.mxu0 %v1227_v26  ;;  %222 = vmatpush.bf16.msra.mxu2 %v1244_v29 }
   0xb   :  { %280 = vmatpush.bf16.msra.mxu3 %v1239_v28 }
   0xd   :  { %297 = vmatpush.bf16.msrb.mxu1 %v1232_v27 }
   0xe   :  { %355 = vmatpush.bf16.msrb.mxu2 %v1227_v26  ;;  %660 = vmatpush.bf16.msrb.mxu0 %v1239_v28 }
   0xf   :  { %373 = vmatpush.bf16.msrb.mxu3 %v1232_v27 }
  0x11   :  { %298 = vmatpush.bf16.msrb.mxu1 %v1244_v29 }
  0x12   :  { %356 = vmatpush.bf16.msrb.mxu2 %v1239_v28 }
  0x13   :  { %374 = vmatpush.bf16.msrb.mxu3 %v1244_v29 }
  0x19   :  { %948 = vmatmul.msk.bf16.gmra.mxu0 %vm85_vm0, %v997_v61 }
  0x86   :  { %v107_v4 = vpop.f32.mrf.mxu0 }
  0x87   :  { %v108_v5 = vadd.f32 %v1215_v3, %v107_v4 }
  0x89   :  { %1031 = vtanh.f32 %v108_v5  ;;  %v951_v7 = vmul.f32 -1.442695, %v108_v5 }
  0x8b   :  { %1033 = vpow2.f32 %v951_v7 }
  0x8e   :  { %v109_v35 = vpop.f32.mrf.mxu0 }
  0x8f   :  { %v1032_v6 = vpop.eup %1031  ;;  %v110_v36 = vadd.f32 %v1215_v3, %v109_v35 }
  0x90   :  { %149 = vrot.lane.b32.xlu0 %v1032_v6, %s1149_s2 }
  0x91   :  { %v1034_v8 = vpop.eup %1033 }
  0x92   :  { %v130_v9 = vadd.f32 1.0, %v1034_v8 }
  0x94   :  { %1035 = vrcp.f32 %v130_v9  ;;  %v142_v15 = vand.u32 2147483648, %v130_v9  ;;  %vm136_vm2 = vweird.f32 %v130_v9  ;;  %v140_v16 = vand.u32 2147483647, %v130_v9 }
  0x96   :  { %v143_v18 = vor.u32 1.1754944e-38, %v142_v15  ;;  %vm141_vm4 = vcmp.eq.f32.partialorder %v140_v16, 8.507059e+37  ;;  %v112_v2 = vpop.f32.mrf.mxu0 }
  0x97   :  { %v113_v4 = vadd.f32 %v1215_v3, %v112_v2 }
  0x9a   :  { %v1036_v10 = vpop.eup %1035 }
  0x9b   :  { %v132_v11 = vmul.f32 %v1036_v10, %v130_v9  ;;  %vm137_vm1 = vweird.f32 %v1036_v10 }
  0x9c   :  { %vm138_vm3 = vmor %vm136_vm2, %vm137_vm1 }
  0x9d   :  { %v133_v12 = vsub.f32 1.0, %v132_v11 }
  0x9f   :  { %v134_v13 = vmul.f32 %v1036_v10, %v133_v12 }
  0xa1   :  { %v135_v14 = vadd.f32 %v1036_v10, %v134_v13 }
  0xa3   :  { %v139_v17 = vsel %vm138_vm3, %v1036_v10, %v135_v14 }
  0xa4   :  { %v144_v20 = vsel %vm141_vm4, %v143_v18, %v139_v17 }
  0xa5   :  { %v147_v22 = vmul.f32 0.0, %v144_v20 }
 0x102   :  { %v150_v19 = vpop.permute.xlu0 %149 }
 0x103   :  { %v152_v21 = vmul.f32 %v150_v19, %v144_v20 }
 0x105   :  { %154 = vrot.lane.b32.xlu0 %v152_v21, %s1150_s9 }
 0x177   :  { %v155_v23 = vpop.permute.xlu0 %154 }
 0x178   :  { %v1220_v24 = vadd.f32 %v155_v23, %v147_v22 }
 0x17a   :  { %1037 = vtanh.f32 %v1220_v24 }
 0x180   :  { %v1038_v25 = vpop.eup %1037 }
 0x181   :  { %160 = vrot.lane.b32.xlu1 %v1038_v25, %s1149_s2 }
 0x1f3   :  { %v161_v30 = vpop.permute.xlu1 %160 }
 0x1f4   :  { %v1258_v31 = vmul.f32 %v161_v30, %v144_v20 }
 0x1f6   :  { %v164_v32 = vpack.c.bf16 %v1258_v31, %v1258_v31 }
 0x1f8   :  { %167 = vrot.lane.b32.xlu1 %v164_v32, %s1150_s9 }
 0x26a   :  { %v168_v33 = vpop.permute.xlu1 %167 }
 0x26b   :  { %960 = vmatmul.msk.bf16.vlgmr.msra.gmra.mxu1 %vm85_vm0, %v168_v33  ;;  %969 = vmatmul.msk.bf16.vlgmr.msra.gmra.mxu2 %vm85_vm0, %v168_v33 }
 0x26c   :  { %449 = vmatpush.bf16.msra.mxu2 %v1232_v27  ;;  %431 = vmatpush.bf16.msra.mxu1 %v1227_v26 }
 0x270   :  { %450 = vmatpush.bf16.msra.mxu2 %v1244_v29  ;;  %432 = vmatpush.bf16.msra.mxu1 %v1239_v28 }
 0x2e8   :  { %v1269_v34 = vpop.f32.mrf.mxu1 }
 0x2ee   :  { %v224_v37 = vpop.f32.mrf.mxu2 }
 0x2ef   :  { %v228_v38 = vadd.f32 %v224_v37, %v110_v36 }
 0x2f0   :  { %v195_v39 = vpop.f32.mrf.mxu1 }
 0x2f1   :  { %1039 = vtanh.f32 %v228_v38  ;;  %v970_v42 = vmul.f32 -1.442695, %v228_v38 }
 0x2f3   :  { %1041 = vpow2.f32 %v970_v42 }
 0x2f6   :  { %v226_v40 = vpop.f32.mrf.mxu2 }
 0x2f7   :  { %v1040_v41 = vpop.eup %1039  ;;  %v114_v40 = vpop.f32.mrf.mxu0 }
 0x2f8   :  { %251 = vrot.lane.b32.xlu2 %v1040_v41, %s1149_s2  ;;  %v115_v41 = vadd.f32 %v1215_v3, %v114_v40 }
 0x2f9   :  { %v1042_v43 = vpop.eup %1041 }
 0x2fa   :  { %v232_v44 = vadd.f32 1.0, %v1042_v43 }
 0x2fc   :  { %1043 = vrcp.f32 %v232_v44  ;;  %v244_v50 = vand.u32 2147483648, %v232_v44  ;;  %vm238_vm6 = vweird.f32 %v232_v44  ;;  %v242_v51 = vand.u32 2147483647, %v232_v44 }
 0x2fe   :  { %v245_v53 = vor.u32 1.1754944e-38, %v244_v50  ;;  %vm243_vm8 = vcmp.eq.f32.partialorder %v242_v51, 8.507059e+37 }
 0x302   :  { %v1044_v45 = vpop.eup %1043 }
 0x303   :  { %v234_v46 = vmul.f32 %v1044_v45, %v232_v44  ;;  %vm239_vm5 = vweird.f32 %v1044_v45 }
 0x304   :  { %vm240_vm7 = vmor %vm238_vm6, %vm239_vm5 }
 0x305   :  { %v235_v47 = vsub.f32 1.0, %v234_v46 }
 0x307   :  { %v236_v48 = vmul.f32 %v1044_v45, %v235_v47 }
 0x309   :  { %v237_v49 = vadd.f32 %v1044_v45, %v236_v48 }
 0x30b   :  { %v241_v52 = vsel %vm240_vm7, %v1044_v45, %v237_v49 }
 0x30c   :  { %v246_v55 = vsel %vm243_vm8, %v245_v53, %v241_v52 }
 0x30d   :  { %v249_v57 = vmul.f32 %v246_v55, %v1220_v24 }
 0x352   :  { %v252_v54 = vpop.permute.xlu2 %251 }
 0x353   :  { %v254_v56 = vmul.f32 %v252_v54, %v246_v55 }
 0x355   :  { %256 = vrot.lane.b32.xlu2 %v254_v56, %s1150_s9 }
 0x3af   :  { %v257_v58 = vpop.permute.xlu2 %256 }
 0x3b0   :  { %v259_v59 = vadd.f32 %v257_v58, %v249_v57 }
 0x3b2   :  { %1045 = vtanh.f32 %v259_v59 }
 0x3b8   :  { %v1046_v60 = vpop.eup %1045 }
 0x3b9   :  { %262 = vrot.lane.b32.xlu0 %v1046_v60, %s1149_s2 }
 0x42b   :  { %v263_v62 = vpop.permute.xlu0 %262 }
 0x42c   :  { %v1280_v63 = vmul.f32 %v263_v62, %v246_v55 }
 0x42e   :  { %v266_v0 = vpack.c.bf16 %v1280_v63, %v1280_v63 }
 0x430   :  { %268 = vrot.lane.b32.xlu1 %v266_v0, %s1150_s9 }
 0x4a2   :  { %v269_v1 = vpop.permute.xlu1 %268 }
 0x4a3   :  { %971 = vmatmul.msk.bf16.vlgmr.msra.gmra.mxu3 %vm85_vm0, %v269_v1  ;;  %972 = vmatmul.msk.bf16.vlgmr.msrb.gmra.mxu1 %vm85_vm0, %v269_v1 }
 0x4a4   :  { %525 = vmatpush.bf16.msrb.mxu1 %v1232_v27  ;;  %507 = vmatpush.bf16.msra.mxu3 %v1227_v26 }
 0x4a8   :  { %526 = vmatpush.bf16.msrb.mxu1 %v1244_v29  ;;  %508 = vmatpush.bf16.msra.mxu3 %v1239_v28 }
 0x520   :  { %v300_v5 = vpop.f32.mrf.mxu1 }
 0x521   :  { %v304_v6 = vadd.f32 %v300_v5, %v113_v4  ;;  %v998_v5 = vld [vmem:[%s1437_s0 + $0x10] sm:$0xff] }
 0x522   :  { %949 = vmatmul.msk.bf16.gmra.mxu0 %vm85_vm0, %v998_v5 }
 0x523   :  { %1047 = vtanh.f32 %v304_v6  ;;  %v973_v11 = vmul.f32 -1.442695, %v304_v6 }
 0x525   :  { %1049 = vpow2.f32 %v973_v11 }
 0x526   :  { %v1292_v7 = vpop.f32.mrf.mxu3 }
 0x528   :  { %v302_v8 = vpop.f32.mrf.mxu1 }
 0x529   :  { %v1048_v9 = vpop.eup %1047 }
 0x52a   :  { %327 = vrot.lane.b32.xlu2 %v1048_v9, %s1149_s2 }
 0x52b   :  { %v1050_v12 = vpop.eup %1049 }
 0x52c   :  { %v308_v13 = vadd.f32 1.0, %v1050_v12 }
 0x52e   :  { %v284_v10 = vpop.f32.mrf.mxu3  ;;  %1051 = vrcp.f32 %v308_v13  ;;  %v320_v19 = vand.u32 2147483648, %v308_v13  ;;  %vm314_vm10 = vweird.f32 %v308_v13  ;;  %v318_v20 = vand.u32 2147483647, %v308_v13 }
 0x530   :  { %v321_v22 = vor.u32 1.1754944e-38, %v320_v19  ;;  %vm319_vm12 = vcmp.eq.f32.partialorder %v318_v20, 8.507059e+37 }
 0x534   :  { %v1052_v14 = vpop.eup %1051 }
 0x535   :  { %v310_v15 = vmul.f32 %v1052_v14, %v308_v13  ;;  %vm315_vm9 = vweird.f32 %v1052_v14 }
 0x536   :  { %vm316_vm11 = vmor %vm314_vm10, %vm315_vm9 }
 0x537   :  { %v311_v16 = vsub.f32 1.0, %v310_v15 }
 0x539   :  { %v312_v17 = vmul.f32 %v1052_v14, %v311_v16 }
 0x53b   :  { %v313_v18 = vadd.f32 %v1052_v14, %v312_v17 }
 0x53d   :  { %v317_v21 = vsel %vm316_vm11, %v1052_v14, %v313_v18 }
 0x53e   :  { %v322_v24 = vsel %vm319_vm12, %v321_v22, %v317_v21 }
 0x53f   :  { %v325_v30 = vmul.f32 %v322_v24, %v259_v59 }
 0x584   :  { %v328_v23 = vpop.permute.xlu2 %327 }
 0x585   :  { %v330_v25 = vmul.f32 %v328_v23, %v322_v24 }
 0x587   :  { %332 = vrot.lane.b32.xlu0 %v330_v25, %s1150_s9 }
 0x59f   :  { %v117_v12 = vpop.f32.mrf.mxu0 }
 0x5a0   :  { %v118_v13 = vadd.f32 %v1215_v3, %v117_v12 }
 0x5f9   :  { %v333_v32 = vpop.permute.xlu0 %332 }
 0x5fa   :  { %v335_v33 = vadd.f32 %v333_v32, %v325_v30 }
 0x5fc   :  { %1053 = vtanh.f32 %v335_v33 }
 0x602   :  { %v1054_v35 = vpop.eup %1053 }
 0x603   :  { %338 = vrot.lane.b32.xlu1 %v1054_v35, %s1149_s2 }
 0x675   :  { %v339_v36 = vpop.permute.xlu1 %338 }
 0x676   :  { %v1297_v37 = vmul.f32 %v339_v36, %v322_v24 }
 0x678   :  { %v342_v38 = vpack.c.bf16 %v1297_v37, %v1297_v37 }
 0x67a   :  { %344 = vrot.lane.b32.xlu2 %v342_v38, %s1150_s9 }
 0x6d4   :  { %v345_v39 = vpop.permute.xlu2 %344 }
 0x6d5   :  { %974 = vmatmul.msk.bf16.vlgmr.msrb.gmra.mxu2 %vm85_vm0, %v345_v39  ;;  %975 = vmatmul.msk.bf16.vlgmr.msrb.gmra.mxu3 %vm85_vm0, %v345_v39 }
 0x6d6   :  { %601 = vmatpush.bf16.msrb.mxu3 %v1232_v27  ;;  %583 = vmatpush.bf16.msrb.mxu2 %v1227_v26 }
 0x6da   :  { %602 = vmatpush.bf16.msrb.mxu3 %v1244_v29  ;;  %584 = vmatpush.bf16.msrb.mxu2 %v1239_v28 }
 0x758   :  { %v1309_v42 = vpop.f32.mrf.mxu2  ;;  %v376_v43 = vpop.f32.mrf.mxu3 }
 0x759   :  { %v380_v44 = vadd.f32 %v376_v43, %v115_v41 }
 0x75b   :  { %1055 = vtanh.f32 %v380_v44  ;;  %v976_v48 = vmul.f32 -1.442695, %v380_v44 }
 0x75d   :  { %1057 = vpow2.f32 %v976_v48 }
 0x760   :  { %v360_v45 = vpop.f32.mrf.mxu2  ;;  %v378_v46 = vpop.f32.mrf.mxu3 }
 0x761   :  { %v1056_v47 = vpop.eup %1055  ;;  %v119_v46 = vpop.f32.mrf.mxu0 }
 0x762   :  { %403 = vrot.lane.b32.xlu0 %v1056_v47, %s1149_s2  ;;  %v120_v47 = vadd.f32 %v1215_v3, %v119_v46 }
 0x763   :  { %v1058_v49 = vpop.eup %1057 }
 0x764   :  { %v384_v50 = vadd.f32 1.0, %v1058_v49 }
 0x766   :  { %1059 = vrcp.f32 %v384_v50  ;;  %v396_v56 = vand.u32 2147483648, %v384_v50  ;;  %vm390_vm14 = vweird.f32 %v384_v50  ;;  %v394_v57 = vand.u32 2147483647, %v384_v50 }
 0x768   :  { %v397_v59 = vor.u32 1.1754944e-38, %v396_v56  ;;  %vm395_vm1 = vcmp.eq.f32.partialorder %v394_v57, 8.507059e+37 }
 0x76c   :  { %v1060_v51 = vpop.eup %1059 }
 0x76d   :  { %v386_v52 = vmul.f32 %v1060_v51, %v384_v50  ;;  %vm391_vm13 = vweird.f32 %v1060_v51 }
 0x76e   :  { %vm392_vm15 = vmor %vm390_vm14, %vm391_vm13 }
 0x76f   :  { %v387_v53 = vsub.f32 1.0, %v386_v52 }
 0x771   :  { %v388_v54 = vmul.f32 %v1060_v51, %v387_v53 }
 0x773   :  { %v389_v55 = vadd.f32 %v1060_v51, %v388_v54 }
 0x775   :  { %v393_v58 = vsel %vm392_vm15, %v1060_v51, %v389_v55 }
 0x776   :  { %v398_v61 = vsel %vm395_vm1, %v397_v59, %v393_v58 }
 0x777   :  { %v401_v0 = vmul.f32 %v398_v61, %v335_v33 }
 0x7d4   :  { %v404_v60 = vpop.permute.xlu0 %403 }
 0x7d5   :  { %v406_v62 = vmul.f32 %v404_v60, %v398_v61 }
 0x7d7   :  { %408 = vrot.lane.b32.xlu1 %v406_v62, %s1150_s9 }
 0x849   :  { %v409_v1 = vpop.permute.xlu1 %408 }
 0x84a   :  { %v411_v2 = vadd.f32 %v409_v1, %v401_v0 }
 0x84c   :  { %1061 = vtanh.f32 %v411_v2 }
 0x852   :  { %v1062_v4 = vpop.eup %1061 }
 0x853   :  { %414 = vrot.lane.b32.xlu2 %v1062_v4, %s1149_s2 }
 0x8ad   :  { %v415_v6 = vpop.permute.xlu2 %414 }
 0x8ae   :  { %v1318_v8 = vmul.f32 %v415_v6, %v398_v61 }
 0x8b0   :  { %v418_v9 = vpack.c.bf16 %v1318_v8, %v1318_v8 }
 0x8b2   :  { %420 = vrot.lane.b32.xlu0 %v418_v9, %s1150_s9 }
 0x924   :  { %v421_v10 = vpop.permute.xlu0 %420 }
 0x925   :  { %977 = vmatmul.msk.bf16.vlgmr.msra.gmra.mxu1 %vm85_vm0, %v421_v10  ;;  %978 = vmatmul.msk.bf16.vlgmr.msra.gmra.mxu2 %vm85_vm0, %v421_v10 }
 0x926   :  { %677 = vmatpush.bf16.msra.mxu1 %v1232_v27  ;;  %735 = vmatpush.bf16.msra.mxu2 %v1227_v26 }
 0x92a   :  { %678 = vmatpush.bf16.msra.mxu1 %v1244_v29  ;;  %736 = vmatpush.bf16.msra.mxu2 %v1239_v28 }
 0x9a2   :  { %v1329_v11 = vpop.f32.mrf.mxu1 }
 0x9a8   :  { %v452_v14 = vpop.f32.mrf.mxu2 }
 0x9a9   :  { %v456_v15 = vadd.f32 %v452_v14, %v118_v13  ;;  %v999_v14 = vld [vmem:[%s1437_s0 + $0x18] sm:$0xff] }
 0x9aa   :  { %v436_v16 = vpop.f32.mrf.mxu1  ;;  %950 = vmatmul.msk.bf16.gmra.mxu0 %vm85_vm0, %v999_v14 }
 0x9ab   :  { %1063 = vtanh.f32 %v456_v15  ;;  %v979_v27 = vmul.f32 -1.442695, %v456_v15 }
 0x9ad   :  { %1065 = vpow2.f32 %v979_v27 }
 0x9b0   :  { %v454_v17 = vpop.f32.mrf.mxu2 }
 0x9b1   :  { %v1064_v18 = vpop.eup %1063 }
 0x9b2   :  { %479 = vrot.lane.b32.xlu1 %v1064_v18, %s1149_s2 }
 0x9b3   :  { %v1066_v26 = vpop.eup %1065 }
 0x9b4   :  { %v460_v19 = vadd.f32 1.0, %v1066_v26 }
 0x9b6   :  { %1067 = vrcp.f32 %v460_v19  ;;  %v472_v23 = vand.u32 2147483648, %v460_v19  ;;  %vm466_vm3 = vweird.f32 %v460_v19  ;;  %v470_v24 = vand.u32 2147483647, %v460_v19 }
 0x9b8   :  { %v473_v30 = vor.u32 1.1754944e-38, %v472_v23  ;;  %vm471_vm5 = vcmp.eq.f32.partialorder %v470_v24, 8.507059e+37 }
 0x9bc   :  { %v1068_v29 = vpop.eup %1067 }
 0x9bd   :  { %v462_v28 = vmul.f32 %v1068_v29, %v460_v19  ;;  %vm467_vm2 = vweird.f32 %v1068_v29 }
 0x9be   :  { %vm468_vm4 = vmor %vm466_vm3, %vm467_vm2  ;;  %vm747_vm3 = vcmask 7168  }
 0x9bf   :  { %v463_v20 = vsub.f32 1.0, %v462_v28 }
 0x9c1   :  { %v464_v21 = vmul.f32 %v1068_v29, %v463_v20 }
 0x9c3   :  { %v465_v22 = vadd.f32 %v1068_v29, %v464_v21 }
 0x9c5   :  { %v469_v25 = vsel %vm468_vm4, %v1068_v29, %v465_v22  ;;  %vm749_vm4 = vcmask 15360  }
 0x9c6   :  { %v474_v33 = vsel %vm471_vm5, %v473_v30, %v469_v25  ;;  %vm751_vm5 = vcmask 23552  }
 0x9c7   :  { %v477_v36 = vmul.f32 %v474_v33, %v411_v2 }
 0xa24   :  { %v480_v32 = vpop.permute.xlu1 %479 }
 0xa25   :  { %v482_v35 = vmul.f32 %v480_v32, %v474_v33 }
 0xa27   :  { %484 = vrot.lane.b32.xlu2 %v482_v35, %s1150_s9  ;;  %v122_v27 = vpop.f32.mrf.mxu0 }
 0xa28   :  { %v123_v26 = vadd.f32 %v1215_v3, %v122_v27 }
 0xa81   :  { %v485_v38 = vpop.permute.xlu2 %484 }
 0xa82   :  { %v487_v39 = vadd.f32 %v485_v38, %v477_v36 }
 0xa84   :  { %1069 = vtanh.f32 %v487_v39 }
 0xa8a   :  { %v1070_v40 = vpop.eup %1069 }
 0xa8b   :  { %490 = vrot.lane.b32.xlu0 %v1070_v40, %s1149_s2 }
 0xafd   :  { %v491_v41 = vpop.permute.xlu0 %490 }
 0xafe   :  { %v1335_v43 = vmul.f32 %v491_v41, %v474_v33 }
 0xb00   :  { %v494_v44 = vpack.c.bf16 %v1335_v43, %v1335_v43 }
 0xb02   :  { %496 = vrot.lane.b32.xlu1 %v494_v44, %s1150_s9 }
 0xb74   :  { %v497_v45 = vpop.permute.xlu1 %496 }
 0xb75   :  { %980 = vmatmul.msk.bf16.vlgmr.msra.gmra.mxu3 %vm85_vm0, %v497_v45  ;;  %981 = vmatmul.msk.bf16.vlgmr.msrb.gmra.mxu1 %vm85_vm0, %v497_v45 }
 0xbf2   :  { %v528_v48 = vpop.f32.mrf.mxu1 }
 0xbf3   :  { %v532_v49 = vadd.f32 %v528_v48, %v120_v47 }
 0xbf5   :  { %1071 = vtanh.f32 %v532_v49  ;;  %v982_v54 = vmul.f32 -1.442695, %v532_v49 }
 0xbf7   :  { %1073 = vpow2.f32 %v982_v54 }
 0xbf8   :  { %v1343_v50 = vpop.f32.mrf.mxu3 }
 0xbfa   :  { %v530_v51 = vpop.f32.mrf.mxu1 }
 0xbfb   :  { %v1072_v52 = vpop.eup %1071 }
 0xbfc   :  { %555 = vrot.lane.b32.xlu2 %v1072_v52, %s1149_s2 }
 0xbfd   :  { %v1074_v55 = vpop.eup %1073 }
 0xbfe   :  { %v536_v56 = vadd.f32 1.0, %v1074_v55 }
 0xc00   :  { %v512_v53 = vpop.f32.mrf.mxu3  ;;  %1075 = vrcp.f32 %v536_v56  ;;  %v548_v62 = vand.u32 2147483648, %v536_v56  ;;  %vm542_vm7 = vweird.f32 %v536_v56  ;;  %v546_v0 = vand.u32 2147483647, %v536_v56 }
 0xc02   :  { %v549_v2 = vor.u32 1.1754944e-38, %v548_v62  ;;  %vm547_vm9 = vcmp.eq.f32.partialorder %v546_v0, 8.507059e+37 }
 0xc06   :  { %v1076_v57 = vpop.eup %1075 }
 0xc07   :  { %v538_v58 = vmul.f32 %v1076_v57, %v536_v56  ;;  %vm543_vm6 = vweird.f32 %v1076_v57  ;;  %v124_v56 = vpop.f32.mrf.mxu0 }
 0xc08   :  { %vm544_vm8 = vmor %vm542_vm7, %vm543_vm6  ;;  %vm753_vm6 = vcmask 31744   ;;  %vm755_vm7 = vcmask 39936  }
 0xc09   :  { %v539_v59 = vsub.f32 1.0, %v538_v58 }
 0xc0b   :  { %v540_v60 = vmul.f32 %v1076_v57, %v539_v59 }
 0xc0d   :  { %v541_v61 = vadd.f32 %v1076_v57, %v540_v60 }
 0xc0f   :  { %v545_v1 = vsel %vm544_vm8, %v1076_v57, %v541_v61  ;;  %v125_v57 = vadd.f32 %v1215_v3, %v124_v56  ;;  %vm757_vm8 = vcmask 48128  }
 0xc10   :  { %v550_v5 = vsel %vm547_vm9, %v549_v2, %v545_v1  ;;  %vm759_vm9 = vcmask 56320  }
 0xc11   :  { %v553_v9 = vmul.f32 %v550_v5, %v487_v39 }
 0xc56   :  { %v556_v4 = vpop.permute.xlu2 %555 }
 0xc57   :  { %v558_v6 = vmul.f32 %v556_v4, %v550_v5 }
 0xc59   :  { %560 = vrot.lane.b32.xlu0 %v558_v6, %s1150_s9 }
 0xccb   :  { %v561_v10 = vpop.permute.xlu0 %560 }
 0xccc   :  { %v563_v12 = vadd.f32 %v561_v10, %v553_v9 }
 0xcce   :  { %1077 = vtanh.f32 %v563_v12 }
 0xcd4   :  { %v1078_v13 = vpop.eup %1077 }
 0xcd5   :  { %566 = vrot.lane.b32.xlu1 %v1078_v13, %s1149_s2 }
 0xd47   :  { %v567_v15 = vpop.permute.xlu1 %566 }
 0xd48   :  { %v1352_v16 = vmul.f32 %v567_v15, %v550_v5 }
 0xd4a   :  { %v570_v17 = vpack.c.bf16 %v1352_v16, %v1352_v16 }
 0xd4c   :  { %572 = vrot.lane.b32.xlu2 %v570_v17, %s1150_s9 }
 0xda6   :  { %v573_v18 = vpop.permute.xlu2 %572 }
 0xda7   :  { %983 = vmatmul.msk.bf16.vlgmr.msrb.gmra.mxu2 %vm85_vm0, %v573_v18  ;;  %984 = vmatmul.msk.bf16.vlgmr.msrb.gmra.mxu3 %vm85_vm0, %v573_v18 }
 0xe2a   :  { %v1360_v19 = vpop.f32.mrf.mxu2  ;;  %v604_v29 = vpop.f32.mrf.mxu3 }
 0xe2b   :  { %v608_v28 = vadd.f32 %v604_v29, %v123_v26  ;;  %v1027_v26 = vld [vmem:[%s1442_s5 + $0x1] ss:$0 sm:$0xff] }
 0xe2c   :  { %v194_v29 = vadd.f32 %v1027_v26, %v1269_v34 }
 0xe2d   :  { %1079 = vtanh.f32 %v608_v28  ;;  %v985_v23 = vmul.f32 -1.442695, %v608_v28  ;;  %v435_v28 = vadd.f32 %v1027_v26, %v1329_v11 }
 0xe2f   :  { %1081 = vpow2.f32 %v985_v23  ;;  %v511_v23 = vadd.f32 %v1027_v26, %v1343_v50 }
 0xe32   :  { %v588_v20 = vpop.f32.mrf.mxu2  ;;  %v606_v21 = vpop.f32.mrf.mxu3 }
 0xe33   :  { %v1080_v22 = vpop.eup %1079  ;;  %v1028_v20 = vld [vmem:[%s1442_s5 + $0x2] ss:$0 sm:$0xff] }
 0xe34   :  { %631 = vrot.lane.b32.xlu0 %v1080_v22, %s1149_s2 }
 0xe35   :  { %v1082_v24 = vpop.eup %1081 }
 0xe36   :  { %v612_v25 = vadd.f32 1.0, %v1082_v24 }
 0xe38   :  { %1083 = vrcp.f32 %v612_v25  ;;  %v624_v38 = vand.u32 2147483648, %v612_v25  ;;  %vm618_vm11 = vweird.f32 %v612_v25  ;;  %v622_v39 = vand.u32 2147483647, %v612_v25 }
 0xe3a   :  { %v625_v41 = vor.u32 1.1754944e-38, %v624_v38  ;;  %vm623_vm13 = vcmp.eq.f32.partialorder %v622_v39, 8.507059e+37  ;;  %v283_v39 = vadd.f32 %v1027_v26, %v1292_v7 }
 0xe3e   :  { %v1084_v30 = vpop.eup %1083 }
 0xe3f   :  { %v614_v32 = vmul.f32 %v1084_v30, %v612_v25  ;;  %vm619_vm10 = vweird.f32 %v1084_v30 }
 0xe40   :  { %vm620_vm12 = vmor %vm618_vm11, %vm619_vm10  ;;  %vm761_vm10 = vcmask 64512  }
 0xe41   :  { %v615_v33 = vsub.f32 1.0, %v614_v32 }
 0xe43   :  { %v616_v35 = vmul.f32 %v1084_v30, %v615_v33 }
 0xe45   :  { %v617_v36 = vadd.f32 %v1084_v30, %v616_v35 }
 0xe47   :  { %v621_v40 = vsel %vm620_vm12, %v1084_v30, %v617_v36 }
 0xe48   :  { %v626_v45 = vsel %vm623_vm13, %v625_v41, %v621_v40  ;;  %v587_v40 = vadd.f32 %v1027_v26, %v1360_v19  ;;  %v359_v19 = vadd.f32 %v1027_v26, %v1309_v42 }
 0xe49   :  { %v629_v47 = vmul.f32 %v626_v45, %v563_v12 }
 0xea6   :  { %v632_v44 = vpop.permute.xlu0 %631 }
 0xea7   :  { %v634_v46 = vmul.f32 %v632_v44, %v626_v45 }
 0xea9   :  { %636 = vrot.lane.b32.xlu1 %v634_v46, %s1150_s9 }
 0xf1b   :  { %v637_v48 = vpop.permute.xlu1 %636 }
 0xf1c   :  { %v1364_v49 = vadd.f32 %v637_v48, %v629_v47 }
 0xf1e   :  { %1085 = vtanh.f32 %v1364_v49 }
 0xf24   :  { %v1086_v51 = vpop.eup %1085 }
 0xf25   :  { %642 = vrot.lane.b32.xlu2 %v1086_v51, %s1149_s2 }
 0xf7f   :  { %v643_v52 = vpop.permute.xlu2 %642 }
 0xf80   :  { %v1368_v53 = vmul.f32 %v643_v52, %v626_v45 }
 0xf82   :  { %v646_v54 = vpack.c.bf16 %v1368_v53, %v1368_v53 }
 0xf84   :  { %648 = vrot.lane.b32.xlu0 %v646_v54, %s1150_s9 }
 0xff6   :  { %v649_v55 = vpop.permute.xlu0 %648 }
 0xff7   :  { %986 = vmatmul.msk.bf16.vlgmr.msrb.gmra.mxu0 %vm85_vm0, %v649_v55  ;;  %987 = vmatmul.msk.bf16.vlgmr.msra.gmra.mxu1 %vm85_vm0, %v649_v55 }
0x1074   :  { %v1376_v58 = vpop.f32.mrf.mxu0  ;;  %v680_v59 = vpop.f32.mrf.mxu1 }
0x1075   :  { %v684_v60 = vadd.f32 %v680_v59, %v125_v57  ;;  %v663_v52 = vadd.f32 %v1027_v26, %v1376_v58 }
0x1077   :  { %1087 = vtanh.f32 %v684_v60  ;;  %v988_v1 = vmul.f32 -1.442695, %v684_v60 }
0x1079   :  { %1089 = vpow2.f32 %v988_v1 }
0x107c   :  { %v664_v61 = vpop.f32.mrf.mxu0  ;;  %v682_v62 = vpop.f32.mrf.mxu1 }
0x107d   :  { %v1088_v0 = vpop.eup %1087 }
0x107e   :  { %707 = vrot.lane.b32.xlu1 %v1088_v0, %s1149_s2 }
0x107f   :  { %v1090_v2 = vpop.eup %1089 }
0x1080   :  { %v688_v4 = vadd.f32 1.0, %v1090_v2 }
0x1082   :  { %1091 = vrcp.f32 %v688_v4  ;;  %v700_v12 = vand.u32 2147483648, %v688_v4  ;;  %vm694_vm15 = vweird.f32 %v688_v4  ;;  %v698_v13 = vand.u32 2147483647, %v688_v4 }
0x1083   :  { %1093 = vtanh.f32 %v194_v29 }
0x1084   :  { %v701_v15 = vor.u32 1.1754944e-38, %v700_v12  ;;  %vm699_vm2 = vcmp.eq.f32.partialorder %v698_v13, 8.507059e+37  ;;  %1095 = vtanh.f32 %v435_v28 }
0x1085   :  { %1097 = vtanh.f32 %v511_v23 }
0x1088   :  { %v1092_v5 = vpop.eup %1091 }
0x1089   :  { %v690_v6 = vmul.f32 %v1092_v5, %v688_v4  ;;  %vm695_vm14 = vweird.f32 %v1092_v5  ;;  %v1094_v21 = vpop.eup %1093 }
0x108a   :  { %vm696_vm1 = vmor %vm694_vm15, %vm695_vm14  ;;  %v199_v22 = vmul.f32 %v1094_v21, %v1028_v20  ;;  %v1096_v25 = vpop.eup %1095 }
0x108b   :  { %v691_v9 = vsub.f32 1.0, %v690_v6  ;;  %v439_v30 = vmul.f32 %v1096_v25, %v1028_v20  ;;  %v1098_v32 = vpop.eup %1097  ;;  %v1151_v25 = vmov 2  }
0x108c   :  { %v200_v24 = vsel %vm85_vm0, %v199_v22, 0.0  ;;  %v515_v11 = vmul.f32 %v1098_v32, %v1028_v20  ;;  %1019 = vset.pattern.permute.xlu1 %v1151_v25 }
0x108d   :  { %v692_v10 = vmul.f32 %v1092_v5, %v691_v9  ;;  %v440_v34 = vsel %vm85_vm0, %v439_v30, 0.0  ;;  %v1152_v30 = vmov 1  }
0x108e   :  { %v516_v33 = vsel %vm85_vm0, %v515_v11, 0.0  ;;  %1018 = vset.pattern.permute.xlu0 %v1152_v30 }
0x108f   :  { %v693_v3 = vadd.f32 %v1092_v5, %v692_v10 }
0x1091   :  { %v697_v14 = vsel %vm696_vm1, %v1092_v5, %v693_v3 }
0x1092   :  { %v702_v18 = vsel %vm699_vm2, %v701_v15, %v697_v14 }
0x1093   :  { %v705_v35 = vmul.f32 %v702_v18, %v1364_v49 }
0x10f0   :  { %v708_v17 = vpop.permute.xlu1 %707 }
0x10f1   :  { %v710_v27 = vmul.f32 %v708_v17, %v702_v18 }
0x10f3   :  { %712 = vrot.lane.b32.xlu2 %v710_v27, %s1150_s9 }
0x111c   :  { %201 = vadd.xlane.f32.xlu2 %v200_v24 }
0x1124   :  { %441 = vadd.xlane.f32.xlu2 %v440_v34  ;;  %v1153_v34 = vmov 0  }
0x1125   :  { %1017 = vset.pattern.permute.xlu2 %v1153_v34 }
0x112c   :  { %517 = vadd.xlane.f32.xlu2 %v516_v33 }
0x114d   :  { %v713_v36 = vpop.permute.xlu2 %712 }
0x114e   :  { %v715_v38 = vadd.f32 %v713_v36, %v705_v35 }
0x1150   :  { %1099 = vtanh.f32 %v715_v38 }
0x1151   :  { %1101 = vtanh.f32 %v283_v39 }
0x1152   :  { %1103 = vtanh.f32 %v587_v40 }
0x1153   :  { %1105 = vtanh.f32 %v359_v19  ;;  %v1159_v19 = vmov 5  }
0x1154   :  { %1107 = vtanh.f32 %v663_v52 }
0x1156   :  { %v1100_v50 = vpop.eup %1099 }
0x1157   :  { %718 = vrot.lane.b32.xlu0 %v1100_v50, %s1149_s2  ;;  %v1102_v41 = vpop.eup %1101 }
0x1158   :  { %v287_v44 = vmul.f32 %v1102_v41, %v1028_v20  ;;  %v1104_v46 = vpop.eup %1103 }
0x1159   :  { %v591_v47 = vmul.f32 %v1104_v46, %v1028_v20  ;;  %v1106_v54 = vpop.eup %1105  ;;  %v1029_v46 = vld [vmem:[%s1442_s5 + $0x3] ss:$0 sm:$0xff] }
0x115a   :  { %v288_v45 = vsel %vm85_vm0, %v287_v44, 0.0  ;;  %v363_v55 = vmul.f32 %v1106_v54, %v1028_v20  ;;  %v1108_v57 = vpop.eup %1107 }
0x115b   :  { %v592_v48 = vsel %vm85_vm0, %v591_v47, 0.0  ;;  %v667_v59 = vmul.f32 %v1108_v57, %v1028_v20  ;;  %v1154_v47 = vmov 4  }
0x115c   :  { %v364_v56 = vsel %vm85_vm0, %v363_v55, 0.0 }
0x115d   :  { %v668_v60 = vsel %vm85_vm0, %v667_v59, 0.0 }
0x1181   :  { %289 = vadd.xlane.f32.xlu0 %v288_v45 }
0x1189   :  { %593 = vadd.xlane.f32.xlu0 %v592_v48  ;;  %v1156_v48 = vmov 3  }
0x118f   :  { %v202_v4 = vpop.xlane.xlu2 %201 }
0x1197   :  { %v442_v5 = vpop.xlane.xlu2 %441 }
0x119f   :  { %v518_v12 = vpop.xlane.xlu2 %517 }
0x11c9   :  { %v719_v49 = vpop.permute.xlu0 %718 }
0x11ca   :  { %v1398_v51 = vmul.f32 %v719_v49, %v702_v18  ;;  %v1157_v49 = vmov 7  }
0x11cc   :  { %v722_v7 = vpack.c.bf16 %v1398_v51, %v1398_v51 }
0x11ce   :  { %724 = vrot.lane.b32.xlu1 %v722_v7, %s1150_s9  ;;  %v1158_v7 = vmov 6  }
0x11f4   :  { %v290_v6 = vpop.xlane.xlu0 %289 }
0x11f5   :  { %v748_v10 = vsel %vm747_vm3, %v202_v4, %v290_v6 }
0x11f8   :  { %365 = vadd.xlane.f32.xlu1 %v364_v56 }
0x11fc   :  { %v594_v17 = vpop.xlane.xlu0 %593 }
0x1200   :  { %669 = vadd.xlane.f32.xlu1 %v668_v60 }
0x1240   :  { %v725_v61 = vpop.permute.xlu1 %724 }
0x1241   :  { %989 = vmatmul.msk.bf16.vlgmr.msra.gmra.mxu2 %vm85_vm0, %v725_v61 }
0x126b   :  { %v366_v9 = vpop.xlane.xlu1 %365 }
0x126c   :  { %v750_v3 = vsel %vm749_vm4, %v748_v10, %v366_v9 }
0x126d   :  { %v752_v13 = vsel %vm751_vm5, %v750_v3, %v442_v5  ;;  %vm901_vm5 = vcmask 0  }
0x126e   :  { %v754_v14 = vsel %vm753_vm6, %v752_v13, %v518_v12 }
0x126f   :  { %v756_v18 = vsel %vm755_vm7, %v754_v14, %v594_v17 }
0x1273   :  { %v670_v15 = vpop.xlane.xlu1 %669 }
0x1274   :  { %v758_v27 = vsel %vm757_vm8, %v756_v18, %v670_v15 }
0x12c4   :  { %v738_v62 = vpop.f32.mrf.mxu2 }
0x12c5   :  { %v739_v0 = vadd.f32 %v1027_v26, %v738_v62 }
0x12c7   :  { %1109 = vtanh.f32 %v739_v0 }
0x12cc   :  { %v740_v42 = vpop.f32.mrf.mxu2 }
0x12cd   :  { %v1110_v1 = vpop.eup %1109 }
0x12ce   :  { %v743_v58 = vmul.f32 %v1110_v1, %v1028_v20 }
0x12d0   :  { %v744_v2 = vsel %vm85_vm0, %v743_v58, 0.0 }
0x12d1   :  { %745 = vadd.xlane.f32.xlu2 %v744_v2 }
0x1344   :  { %v746_v26 = vpop.xlane.xlu2 %745 }
0x1345   :  { %v760_v29 = vsel %vm759_vm9, %v758_v27, %v746_v26 }
0x1346   :  { %v762_v28 = vsel %vm761_vm10, %v760_v29, -inf }
0x1347   :  { %763 = vmax.xlane.f32.xlu0 %v762_v28 }
0x13ba   :  { %v764_v20 = vpop.xlane.xlu0 %763 }
0x13bb   :  { %v765_v21 = vsub.f32 %v760_v29, %v764_v20 }
0x13bd   :  { %v766_v22 = vmul.f32 1.442695, %v765_v21 }
0x13bf   :  { %1111 = vpow2.f32 %v766_v22 }
0x13c5   :  { %v1112_v23 = vpop.eup %1111 }
0x13c6   :  { %v768_v24 = vsel %vm761_vm10, %v1112_v23, 0.0 }
0x13c7   :  { %769 = vadd.xlane.f32.xlu1 %v768_v24 }
0x143a   :  { %v770_v32 = vpop.xlane.xlu1 %769 }
0x143b   :  { %1113 = vrcp.f32 %v770_v32  ;;  %v782_v36 = vand.u32 2147483648, %v770_v32  ;;  %v780_v50 = vand.u32 2147483647, %v770_v32  ;;  %vm776_vm12 = vweird.f32 %v770_v32 }
0x143d   :  { %v783_v40 = vor.u32 1.1754944e-38, %v782_v36  ;;  %vm781_vm14 = vcmp.eq.f32.partialorder %v780_v50, 8.507059e+37 }
0x1441   :  { %v1114_v11 = vpop.eup %1113 }
0x1442   :  { %v772_v33 = vmul.f32 %v1114_v11, %v770_v32  ;;  %vm777_vm11 = vweird.f32 %v1114_v11  ;;  %v871_v32 = vlaneseq }
0x1443   :  { %vm778_vm13 = vmor %vm776_vm12, %vm777_vm11 }
0x1444   :  { %v773_v35 = vsub.f32 1.0, %v772_v33  ;;  %v872_v33 = vshrl.u32 %v871_v32, 7 }
0x1446   :  { %v774_v38 = vmul.f32 %v1114_v11, %v773_v35  ;;  %vm873_vm4 = vcmp.lt.s32.totalorder %v872_v33, 4 }
0x1448   :  { %v775_v39 = vadd.f32 %v1114_v11, %v774_v38 }
0x144a   :  { %v779_v41 = vsel %vm778_vm13, %v1114_v11, %v775_v39  ;;  %v870_v11 = vld [vmem:[%s1438_s1] sm:$0xff] }
0x144b   :  { %v784_v44 = vsel %vm781_vm14, %v783_v40, %v779_v41  ;;  %v884_v38 = vsub.f32 1.0, %v870_v11 }
0x144c   :  { %v785_v45 = vmul.f32 %v1112_v23, %v784_v44  ;;  %v1160_v44 = vmov 0.0  }
0x144e   :  { %800 = vperm.xlu1 %1019, %v785_v45   ;;  %794 = vperm.xlu0 %1018, %v785_v45  }
0x144f   :  { %788 = vperm.xlu2 %1017, %v785_v45  }
0x1456   :  { %1021 = vset.pattern.permute.xlu1 %v1154_v47  ;;  %837 = vrot.lane.b32.xlu0 %v1029_v46, %s1155_s27 }
0x1457   :  { %1020 = vset.pattern.permute.xlu2 %v1156_v48  ;;  %812 = vperm.xlu1 %1021, %v785_v45  }
0x1458   :  { %806 = vperm.xlu2 %1020, %v785_v45   ;;  %1025 = vset.pattern.permute.xlu0 %v1157_v49 }
0x145f   :  { %1023 = vset.pattern.permute.xlu1 %v1158_v7 }
0x1460   :  { %1022 = vset.pattern.permute.xlu2 %v1159_v19  ;;  %824 = vperm.xlu1 %1023, %v785_v45  }
0x1461   :  { %818 = vperm.xlu2 %1022, %v785_v45  }
0x1469   :  { %1024 = vset.pattern.permute.xlu2 %v1157_v49 }
0x146a   :  { %830 = vperm.xlu2 %1024, %v785_v45   ;;  %v991_v45 = vsel %vm873_vm4, 1.0, %v1160_v44 }
0x14a9   :  { %v789_v52 = vpop.permute.xlu2 %788 }
0x14aa   :  { %v791_v59 = vmul.f32 %v789_v52, %v1258_v31 }
0x14b2   :  { %v807_v54 = vpop.permute.xlu2 %806 }
0x14b3   :  { %v809_v1 = vmul.f32 %v807_v54, %v1318_v8 }
0x14bb   :  { %v819_v62 = vpop.permute.xlu2 %818 }
0x14bc   :  { %v821_v5 = vmul.f32 %v819_v62, %v1352_v16  ;;  %v1030_v16 = vld [vmem:[%s1442_s5 + $0x4] ss:$0 sm:$0xff] }
0x14c0   :  { %v801_v55 = vpop.permute.xlu1 %800  ;;  %v795_v56 = vpop.permute.xlu0 %794 }
0x14c1   :  { %v797_v57 = vmul.f32 %v795_v56, %v1280_v63  ;;  %v803_v61 = vmul.f32 %v801_v55, %v1297_v37 }
0x14c3   :  { %v798_v60 = vadd.f32 %v797_v57, %v791_v59 }
0x14c4   :  { %v831_v6 = vpop.permute.xlu2 %830 }
0x14c5   :  { %v804_v0 = vadd.f32 %v803_v61, %v798_v60  ;;  %v833_v31 = vmul.f32 %v831_v6, %v1398_v51 }
0x14c7   :  { %v810_v2 = vadd.f32 %v809_v1, %v804_v0 }
0x14c8   :  { %v838_v37 = vpop.permute.xlu0 %837 }
0x14c9   :  { %v813_v42 = vpop.permute.xlu1 %812 }
0x14ca   :  { %v815_v58 = vmul.f32 %v813_v42, %v1335_v43 }
0x14cc   :  { %v816_v4 = vadd.f32 %v815_v58, %v810_v2 }
0x14ce   :  { %v822_v10 = vadd.f32 %v821_v5, %v816_v4 }
0x14d2   :  { %v825_v9 = vpop.permute.xlu1 %824 }
0x14d3   :  { %v827_v63 = vmul.f32 %v825_v9, %v1368_v53 }
0x14d5   :  { %v828_v3 = vadd.f32 %v827_v63, %v822_v10 }
0x14d7   :  { %v834_v12 = vadd.f32 %v833_v31, %v828_v3 }
0x14d9   :  { %v840_v13 = vmul.f32 %v838_v37, %v834_v12 }
0x14db   :  { %842 = vrot.lane.b32.xlu1 %v840_v13, %s1150_s9 }
0x154d   :  { %v843_v8 = vpop.permute.xlu1 %842 }
0x154e   :  { %v845_v43 = vsel %vm85_vm0, %v843_v8, 0.0 }
0x154f   :  { %846 = vadd.xlane.f32.xlu2 %v845_v43 }
0x15c2   :  { %v847_v14 = vpop.xlane.xlu2 %846 }
0x15c3   :  { %v849_v15 = vadd.f32 %v1030_v16, %v847_v14 }
0x15c5   :  { %v990_v17 = vmul.f32 -1.442695, %v849_v15 }
0x15c7   :  { %1115 = vpow2.f32 %v990_v17 }
0x15cd   :  { %v1116_v53 = vpop.eup %1115 }
0x15ce   :  { %v853_v51 = vadd.f32 1.0, %v1116_v53 }
0x15d0   :  { %1117 = vrcp.f32 %v853_v51  ;;  %v865_v29 = vand.u32 2147483648, %v853_v51  ;;  %v863_v20 = vand.u32 2147483647, %v853_v51  ;;  %vm859_vm0 = vweird.f32 %v853_v51 }
0x15d2   :  { %v866_v22 = vor.u32 1.1754944e-38, %v865_v29  ;;  %vm864_vm2 = vcmp.eq.f32.partialorder %v863_v20, 8.507059e+37 }
0x15d6   :  { %v1118_v18 = vpop.eup %1117 }
0x15d7   :  { %v855_v27 = vmul.f32 %v1118_v18, %v853_v51  ;;  %vm860_vm15 = vweird.f32 %v1118_v18 }
0x15d8   :  { %vm861_vm1 = vmor %vm859_vm0, %vm860_vm15 }
0x15d9   :  { %v856_v26 = vsub.f32 1.0, %v855_v27 }
0x15db   :  { %v857_v28 = vmul.f32 %v1118_v18, %v856_v26 }
0x15dd   :  { %v858_v21 = vadd.f32 %v1118_v18, %v857_v28 }
0x15df   :  { %v862_v23 = vsel %vm861_vm1, %v1118_v18, %v858_v21 }
0x15e0   :  { %v867_v24 = vsel %vm864_vm2, %v866_v22, %v862_v23 }
0x15e1   :  { %v876_v25 = vadd.f32 1e-10, %v867_v24  ;;  %v880_v30 = vsub.f32 1.0, %v867_v24  ;;  %869 = vst.msk [vmem:[%s1443_s6] sm:$0xff] %vm747_vm3, %v867_v24  ;;  %s1161_s6 = smov [#allocation2]  }
0x15e2   :  { %s910_s9 = sshll.u32 %s1161_s6, 4  ;;  %s911_s9 = int_to_ptr.vmem [resolvable:$true] %s910_s9 }
0x15e3   :  { %1119 = vlog2.f32 %v876_v25  ;;  %v881_v34 = vadd.f32 1e-10, %v880_v30 }
0x15e5   :  { %1121 = vlog2.f32 %v881_v34 }
0x15e9   :  { %v1120_v35 = vpop.eup %1119 }
0x15ea   :  { %v878_v36 = vmul.f32 0.6931472, %v1120_v35 }
0x15eb   :  { %v1122_v50 = vpop.eup %1121 }
0x15ec   :  { %v883_v39 = vmul.f32 0.6931472, %v1122_v50  ;;  %v879_v40 = vmul.f32 %v878_v36, %v870_v11 }
0x15ee   :  { %v885_v41 = vmul.f32 %v884_v38, %v883_v39 }
0x15f0   :  { %v886_v46 = vadd.f32 %v885_v41, %v879_v40 }
0x15f2   :  { %v887_v47 = vmul.f32 %v991_v45, %v886_v46 }
0x15f4   :  { %v888_v48 = vsel %vm747_vm3, %v887_v47, 0.0 }
0x15f5   :  { %889 = vadd.xlane.f32.xlu0 %v888_v48 }
0x1668   :  { %v890_v49 = vpop.xlane.xlu0 %889 }
0x1669   :  { %v891_v7 = vrot.slane %v890_v49, 4 }
0x166b   :  { %v892_v19 = vadd.f32 %v891_v7, %v890_v49 }
0x166d   :  { %v893_v52 = vrot.slane %v892_v19, 2 }
0x166f   :  { %v894_v54 = vadd.f32 %v893_v52, %v892_v19 }
0x1671   :  { %v895_v55 = vrot.slane %v894_v54, 1 }
0x1673   :  { %v896_v56 = vadd.f32 %v895_v55, %v894_v54 }
0x1675   :  { %1002 = vpush %v896_v56 }
0x16a6   :  { %s1003_s1 = spop %1002 }
0x16a7   :  { %s898_s10 = ssub.f32 0.0, %s1003_s1 }
0x16a9   :  { %s899_s14 = smul.f32 0.25, %s898_s10 }
0x16ab   :  { %v900_v57 = vstv %s899_s14 }
0x16ac   :  { %902 = vst.msk [vmem:[#allocation2] sm:$0x1] %vm901_vm5, %v900_v57 }
0x16ad   :  { %915 = dma.vmem_to_hbm [thread:$0]  %s911_s9, 16, %s913_s13, [#allocation3]  }
0x16ae   :  { %1147 = dma.done.wait [#allocation3], 16  }
0x16af   :  { %1148 = vsyncadd [#allocation3], 4294967280 }
0x16b0   :  { %922 = vsyncpa [#allocation3], 1 }

</bundles_post_ra>
